<compile_context>
chip_gen: v6e
topology: v6e:2x2x1
jax: 0.10.0
libtpu: 0.0.40
codegen_flags: <defaults>
</compile_context>

<pallas_src>
import functools

import jax
import jax.numpy as jnp
from jax.experimental import pallas as pl
from jax.experimental.pallas import tpu as pltpu


def _cdilated_kernel(x_ref, w_ref, o_ref, xpad_ref, *scratch, kh_size, kw_size,
                     dilation, stride, padding, h_in, w_in, h_out, w_out, c_in,
                     b_tile, k, k_pad, use_patch_scratch):
    # x_ref    : (b_tile, H, W, Cin)          unpadded input block (auto-DMA'd)
    # w_ref    : (k_pad, c_out_tile)          im2col-ordered weight tile (zero pad rows)
    # o_ref    : (b_tile, H_out, W_out, c_out_tile)
    # xpad_ref : (b_tile, Hp, Wp, Cin)        zero-padded input slab (VMEM scratch)
    # scratch  : (patch_ref,) iff use_patch_scratch:
    #            (b_tile, H_out*W_out, k_pad) im2col scratch, reused across Cout tiles
    patch_ref = scratch[0] if use_patch_scratch else None
    co = pl.program_id(1)
    m = h_out * w_out
    hp = h_in + 2 * padding
    wp = w_in + 2 * padding
    dt = xpad_ref.dtype

    def tap(kh, kw):
        # One (kh, kw) conv tap for the whole batch tile, as a (b, M, Cin) slab.
        h0 = kh * dilation
        w0 = kw * dilation
        if stride == 1:
            v = xpad_ref[:, h0:h0 + h_out, w0:w0 + w_out, :]
        else:
            # Strided window read at the ref (no dense load + in-register gather).
            v = xpad_ref[:, pl.ds(h0, h_out, stride=stride),
                         pl.ds(w0, w_out, stride=stride), :]
        return v.reshape(b_tile, m, c_in)

    def prepare():
        # In-kernel spatial padding: zero only the halo frame, then copy the
        # unpadded input block into the interior.
        if padding > 0:
            zr = jnp.zeros((b_tile, padding, wp, c_in), dt)
            xpad_ref[:, 0:padding, :, :] = zr
            xpad_ref[:, hp - padding:hp, :, :] = zr
            zc = jnp.zeros((b_tile, h_in, padding, c_in), dt)
            xpad_ref[:, padding:padding + h_in, 0:padding, :] = zc
            xpad_ref[:, padding:padding + h_in, wp - padding:wp, :] = zc
        xpad_ref[:, padding:padding + h_in, padding:padding + w_in, :] = x_ref[...]

        if use_patch_scratch:
            # im2col into VMEM: rebuilt only when the batch tile changes and
            # reused across all Cout tiles.  One vectorized (all-batch) store per
            # tap at a static lane offset; K zero-padded to k_pad lanes so the
            # matmul-side patch loads are full-lane vld's (weight pad rows are 0).
            if k_pad > k:
                patch_ref[:, :, k:] = jnp.zeros((b_tile, m, k_pad - k), dt)
            # TODO(synk): derive the KW taps of a row from one load via pltpu.roll
            # (XLU slot is idle here) instead of KW separately-sliced loads.
            for kh in range(kh_size):
                for kw in range(kw_size):
                    t = kh * kw_size + kw
                    patch_ref[:, :, t * c_in:(t + 1) * c_in] = tap(kh, kw)

    if use_patch_scratch:
        pl.when(co == 0)(prepare)
        patch = patch_ref[...].reshape(b_tile * m, k_pad)
    else:
        # Single Cout tile: nothing to reuse across grid steps, so skip the
        # scratch's VMEM store+reload round trip and feed im2col straight to MXU.
        prepare()
        taps = [tap(kh, kw) for kh in range(kh_size) for kw in range(kw_size)]
        patch = jnp.concatenate(taps, axis=-1).reshape(b_tile * m, k)

    out = jnp.dot(patch, w_ref[...], preferred_element_type=jnp.float32)
    o_ref[...] = out.reshape(b_tile, h_out, w_out, -1).astype(o_ref.dtype)


def _vmem_capacity_bytes():
    try:
        cap = getattr(pltpu.get_tpu_info(), "vmem_capacity_bytes", None)
        if cap:
            return int(cap)
    except Exception:
        pass
    return 64 << 20  # conservative default (v7x per-TensorCore VMEM)


def cdilated_forward(x_nchw, weight_oihw, *, stride=1, dilation=1):
    """Pallas implementation of CDilated.forward (Conv2d, bias=False, groups=1).

    x_nchw      : (N, Cin, H, W)
    weight_oihw : (Cout, Cin, KH, KW)   (nn.Conv2d weight layout)
    """
    n, c_in, h_in, w_in = x_nchw.shape
    c_out, c_in_w, kh_size, kw_size = weight_oihw.shape
    assert c_in == c_in_w, "groups != 1 not supported here"
    padding = ((kh_size - 1) // 2) * dilation
    h_out = (h_in + 2 * padding - dilation * (kh_size - 1) - 1) // stride + 1
    w_out = (w_in + 2 * padding - dilation * (kw_size - 1) - 1) // stride + 1
    hp, wp = h_in + 2 * padding, w_in + 2 * padding
    m = h_out * w_out

    # NCHW -> NHWC (channels on lanes).  Spatial padding is fused into the
    # kernel, so this transpose is the only remaining wrapper HBM pass.
    # TODO(synk): keep NHWC end-to-end across the network (and fold the final
    # Cout slice + NCHW transpose into the consumer) to drop these passes too.
    x_nhwc = jnp.transpose(x_nchw, (0, 2, 3, 1))

    # Cout: zero-pad to a lane-dense multiple of 128; 256-wide tiles when they
    # divide evenly (fills the v6e/v7x MXU; 128 is already right for v5e).
    k = kh_size * kw_size * c_in
    c_out_pad = ((c_out + 127) // 128) * 128
    c_out_tile = 256 if c_out_pad % 256 == 0 else 128
    num_co_tiles = c_out_pad // c_out_tile
    use_patch_scratch = num_co_tiles > 1
    k_pad = ((k + 127) // 128) * 128 if use_patch_scratch else k

    # Weight: OIHW -> (KH, KW, Cin, Cout) -> (K, Cout); row ordering matches the
    # in-kernel im2col tap ordering.  Zero rows for K padding (so padded patch
    # lanes contribute nothing), zero columns for Cout padding.
    w2d = jnp.transpose(weight_oihw, (2, 3, 1, 0)).reshape(k, c_out)
    if k_pad > k or c_out_pad > c_out:
        w2d = jnp.pad(w2d, ((0, k_pad - k), (0, c_out_pad - c_out)))

    itemsize = jnp.dtype(x_nhwc.dtype).itemsize

    def footprint(bt):
        in_blk = bt * h_in * w_in * c_in * itemsize
        w_blk = k_pad * c_out_tile * itemsize
        out_blk = bt * m * c_out_tile * itemsize
        xpad_blk = bt * hp * wp * c_in * itemsize
        patch_blk = bt * m * k_pad * itemsize if use_patch_scratch else 0
        return 2 * (in_blk + w_blk + out_blk) + xpad_blk + patch_blk

    vmem_cap = _vmem_capacity_bytes()
    budget = (3 * vmem_cap) // 8          # ~24 MiB on v7x, ~48 MiB on v5e/v6e
    b_tile = 1
    for bt in range(1, n + 1):
        if n % bt:
            continue
        if n >= 2 and n // bt < 2:
            # Keep >= 2 steps on the "parallel" batch axis so both v7x
            # TensorCores get work (no effect on 1-TC v5e/v6e).
            continue
        if footprint(bt) <= budget:
            b_tile = bt

    est = footprint(b_tile)
    vmem_ceiling = (3 * vmem_cap) // 4    # headroom for compiler internal scratch
    if est > vmem_ceiling:
        # TODO(synk): halo-aware output-row tiling (overlapping H windows) so a
        # single image never has to fit in VMEM; needed for production-size
        # feature maps on v7x (64 MiB per TensorCore).
        raise ValueError(
            f"CDilated Pallas kernel: per-step VMEM footprint {est >> 20} MiB "
            f"exceeds the safe limit {vmem_ceiling >> 20} MiB; this shape needs "
            "halo-aware spatial tiling.")
    vmem_limit = int(min(max(est + (4 << 20), 32 << 20), vmem_ceiling))

    grid = (n // b_tile, num_co_tiles)
    kernel = functools.partial(
        _cdilated_kernel, kh_size=kh_size, kw_size=kw_size, dilation=dilation,
        stride=stride, padding=padding, h_in=h_in, w_in=w_in, h_out=h_out,
        w_out=w_out, c_in=c_in, b_tile=b_tile, k=k, k_pad=k_pad,
        use_patch_scratch=use_patch_scratch)

    scratch_shapes = [pltpu.VMEM((b_tile, hp, wp, c_in), x_nhwc.dtype)]
    if use_patch_scratch:
        scratch_shapes.append(pltpu.VMEM((b_tile, m, k_pad), x_nhwc.dtype))

    # TODO(synk): on v5e/v6e (128 MiB VMEM) pipeline_mode=pl.Buffered(3) on the
    # input spec would hide DMA jitter; kept at default depth for v7x safety.
    out_nhwc = pl.pallas_call(
        kernel,
        out_shape=jax.ShapeDtypeStruct((n, h_out, w_out, c_out_pad), x_nchw.dtype),
        grid_spec=pltpu.PrefetchScalarGridSpec(
            num_scalar_prefetch=0,
            grid=grid,
            in_specs=[
                pl.BlockSpec((b_tile, h_in, w_in, c_in), lambda b, co: (b, 0, 0, 0)),
                pl.BlockSpec((k_pad, c_out_tile), lambda b, co: (0, co)),
            ],
            out_specs=pl.BlockSpec((b_tile, h_out, w_out, c_out_tile),
                                   lambda b, co: (b, 0, 0, co)),
            scratch_shapes=scratch_shapes,
        ),
        compiler_params=pltpu.CompilerParams(
            dimension_semantics=("parallel", "arbitrary"),
            vmem_limit_bytes=vmem_limit),
    )(x_nhwc, w2d)

    # Drop the Cout lane padding, back to NCHW (PyTorch convention).
    return jnp.transpose(out_nhwc[..., :c_out], (0, 3, 1, 2))


def _reference_conv(x_nchw, weight_oihw, *, stride, dilation):
    kh = weight_oihw.shape[2]
    padding = ((kh - 1) // 2) * dilation
    return jax.lax.conv_general_dilated(
        x_nchw, weight_oihw,
        window_strides=(stride, stride),
        padding=[(padding, padding), (padding, padding)],
        rhs_dilation=(dilation, dilation),
        dimension_numbers=("NCHW", "OIHW", "NCHW"))


if __name__ == "__main__":
    base_key = jax.random.PRNGKey(0)

    def run_case(n_in, n_out, k_size, stride, d, N, H, W, case_id):
        key = jax.random.fold_in(base_key, case_id)
        kx, kw = jax.random.split(key)
        x = jax.random.normal(kx, (N, n_in, H, W), dtype=jnp.float32)
        fan_in = n_in * k_size * k_size
        weight = jax.random.normal(kw, (n_out, n_in, k_size, k_size),
                                   dtype=jnp.float32) * (1.0 / fan_in) ** 0.5
        out = jax.block_until_ready(
            cdilated_forward(x, weight, stride=stride, dilation=d))
        ref = _reference_conv(x, weight, stride=stride, dilation=d)
        assert out.shape == ref.shape, (out.shape, ref.shape)
        assert jnp.allclose(out, ref, atol=1e-4, rtol=1e-4), \
            (n_in, n_out, k_size, stride, d)

    # CDilated(nIn=4, nOut=8, kSize=3, stride=1, d=2): single Cout tile path
    # (im2col fed straight to the MXU, no patch scratch).
    run_case(4, 8, 3, 1, 2, N=2, H=16, W=16, case_id=0)
    # Wider Cout exercises the multi-Cout-tile path (K-padded patch scratch
    # built once per batch tile and reused across Cout tiles).
    run_case(8, 320, 3, 1, 1, N=2, H=16, W=16, case_id=1)

    print("KERNEL_OK")
</pallas_src>

<mosaic_0001>
module attributes {stable_mosaic.version = 11 : i64} {
  func.func @_cdilated_kernel(%arg0: i32, %arg1: i32, %arg2: memref<1x16x16x4xf32, #tpu.memory_space<vmem>>, %arg3: memref<36x128xf32, #tpu.memory_space<vmem>>, %arg4: memref<1x16x16x128xf32, #tpu.memory_space<vmem>>, %arg5: memref<1x20x20x4xf32, #tpu.memory_space<vmem>>) attributes {dimension_semantics = [#tpu.dimension_semantics<parallel>, #tpu.dimension_semantics<arbitrary>], iteration_bounds = array<i64: 2, 1>, scalar_prefetch = 0 : i64, scratch_operands = 1 : i64, tpu.core_type = #tpu.core_type<tc>, window_params = [{transform_indices = @transform_0, window_bounds = array<i64: 1, 16, 16, 4>}, {transform_indices = @transform_1, window_bounds = array<i64: 36, 128>}, {transform_indices = @transform_2, window_bounds = array<i64: 1, 16, 16, 128>}]} {
    %cst = arith.constant 0.000000e+00 : f32
    %0 = vector.broadcast %cst : f32 to vector<1x2x20x4xf32>
    %c0 = arith.constant 0 : index
    %c0_0 = arith.constant 0 : index
    %c0_1 = arith.constant 0 : index
    %c0_2 = arith.constant 0 : index
    %1 = vector.load %arg5[%c0, %c0_0, %c0_1, %c0_2] : memref<1x20x20x4xf32, #tpu.memory_space<vmem>>, vector<1x2x20x4xf32>
    tpu.vector_store %arg5[%c0, %c0_0, %c0_1, %c0_2], %0 {strides = array<i32>} : memref<1x20x20x4xf32, #tpu.memory_space<vmem>>, vector<1x2x20x4xf32>,
    %c0_3 = arith.constant 0 : index
    %c18 = arith.constant 18 : index
    %c0_4 = arith.constant 0 : index
    %c0_5 = arith.constant 0 : index
    %2 = vector.load %arg5[%c0_3, %c18, %c0_4, %c0_5] : memref<1x20x20x4xf32, #tpu.memory_space<vmem>>, vector<1x2x20x4xf32>
    tpu.vector_store %arg5[%c0_3, %c18, %c0_4, %c0_5], %0 {strides = array<i32>} : memref<1x20x20x4xf32, #tpu.memory_space<vmem>>, vector<1x2x20x4xf32>,
    %cst_6 = arith.constant 0.000000e+00 : f32
    %3 = vector.broadcast %cst_6 : f32 to vector<1x16x2x4xf32>
    %c0_7 = arith.constant 0 : index
    %c2 = arith.constant 2 : index
    %c0_8 = arith.constant 0 : index
    %c0_9 = arith.constant 0 : index
    %4 = vector.load %arg5[%c0_7, %c2, %c0_8, %c0_9] : memref<1x20x20x4xf32, #tpu.memory_space<vmem>>, vector<1x16x2x4xf32>
    tpu.vector_store %arg5[%c0_7, %c2, %c0_8, %c0_9], %3 {strides = array<i32>} : memref<1x20x20x4xf32, #tpu.memory_space<vmem>>, vector<1x16x2x4xf32>,
    %c0_10 = arith.constant 0 : index
    %c2_11 = arith.constant 2 : index
    %c18_12 = arith.constant 18 : index
    %c0_13 = arith.constant 0 : index
    %5 = vector.load %arg5[%c0_10, %c2_11, %c18_12, %c0_13] : memref<1x20x20x4xf32, #tpu.memory_space<vmem>>, vector<1x16x2x4xf32>
    tpu.vector_store %arg5[%c0_10, %c2_11, %c18_12, %c0_13], %3 {strides = array<i32>} : memref<1x20x20x4xf32, #tpu.memory_space<vmem>>, vector<1x16x2x4xf32>,
    %c0_14 = arith.constant 0 : index
    %c0_15 = arith.constant 0 : index
    %c0_16 = arith.constant 0 : index
    %c0_17 = arith.constant 0 : index
    %6 = vector.load %arg2[%c0_14, %c0_15, %c0_16, %c0_17] : memref<1x16x16x4xf32, #tpu.memory_space<vmem>>, vector<1x16x16x4xf32>
    %c0_18 = arith.constant 0 : index
    %c2_19 = arith.constant 2 : index
    %c2_20 = arith.constant 2 : index
    %c0_21 = arith.constant 0 : index
    %7 = vector.load %arg5[%c0_18, %c2_19, %c2_20, %c0_21] : memref<1x20x20x4xf32, #tpu.memory_space<vmem>>, vector<1x16x16x4xf32>
    tpu.vector_store %arg5[%c0_18, %c2_19, %c2_20, %c0_21], %6 {strides = array<i32>} : memref<1x20x20x4xf32, #tpu.memory_space<vmem>>, vector<1x16x16x4xf32>,
    %c0_22 = arith.constant 0 : index
    %c0_23 = arith.constant 0 : index
    %c0_24 = arith.constant 0 : index
    %c0_25 = arith.constant 0 : index
    %8 = vector.load %arg5[%c0_22, %c0_23, %c0_24, %c0_25] : memref<1x20x20x4xf32, #tpu.memory_space<vmem>>, vector<1x16x16x4xf32>
    %9 = vector.shape_cast %8 : vector<1x16x16x4xf32> to vector<1x256x4xf32>
    %c0_26 = arith.constant 0 : index
    %c0_27 = arith.constant 0 : index
    %c2_28 = arith.constant 2 : index
    %c0_29 = arith.constant 0 : index
    %10 = vector.load %arg5[%c0_26, %c0_27, %c2_28, %c0_29] : memref<1x20x20x4xf32, #tpu.memory_space<vmem>>, vector<1x16x16x4xf32>
    %11 = vector.shape_cast %10 : vector<1x16x16x4xf32> to vector<1x256x4xf32>
    %c0_30 = arith.constant 0 : index
    %c0_31 = arith.constant 0 : index
    %c4 = arith.constant 4 : index
    %c0_32 = arith.constant 0 : index
    %12 = vector.load %arg5[%c0_30, %c0_31, %c4, %c0_32] : memref<1x20x20x4xf32, #tpu.memory_space<vmem>>, vector<1x16x16x4xf32>
    %13 = vector.shape_cast %12 : vector<1x16x16x4xf32> to vector<1x256x4xf32>
    %c0_33 = arith.constant 0 : index
    %c2_34 = arith.constant 2 : index
    %c0_35 = arith.constant 0 : index
    %c0_36 = arith.constant 0 : index
    %14 = vector.load %arg5[%c0_33, %c2_34, %c0_35, %c0_36] : memref<1x20x20x4xf32, #tpu.memory_space<vmem>>, vector<1x16x16x4xf32>
    %15 = vector.shape_cast %14 : vector<1x16x16x4xf32> to vector<1x256x4xf32>
    %c0_37 = arith.constant 0 : index
    %c2_38 = arith.constant 2 : index
    %c2_39 = arith.constant 2 : index
    %c0_40 = arith.constant 0 : index
    %16 = vector.load %arg5[%c0_37, %c2_38, %c2_39, %c0_40] : memref<1x20x20x4xf32, #tpu.memory_space<vmem>>, vector<1x16x16x4xf32>
    %17 = vector.shape_cast %16 : vector<1x16x16x4xf32> to vector<1x256x4xf32>
    %c0_41 = arith.constant 0 : index
    %c2_42 = arith.constant 2 : index
    %c4_43 = arith.constant 4 : index
    %c0_44 = arith.constant 0 : index
    %18 = vector.load %arg5[%c0_41, %c2_42, %c4_43, %c0_44] : memref<1x20x20x4xf32, #tpu.memory_space<vmem>>, vector<1x16x16x4xf32>
    %19 = vector.shape_cast %18 : vector<1x16x16x4xf32> to vector<1x256x4xf32>
    %c0_45 = arith.constant 0 : index
    %c4_46 = arith.constant 4 : index
    %c0_47 = arith.constant 0 : index
    %c0_48 = arith.constant 0 : index
    %20 = vector.load %arg5[%c0_45, %c4_46, %c0_47, %c0_48] : memref<1x20x20x4xf32, #tpu.memory_space<vmem>>, vector<1x16x16x4xf32>
    %21 = vector.shape_cast %20 : vector<1x16x16x4xf32> to vector<1x256x4xf32>
    %c0_49 = arith.constant 0 : index
    %c4_50 = arith.constant 4 : index
    %c2_51 = arith.constant 2 : index
    %c0_52 = arith.constant 0 : index
    %22 = vector.load %arg5[%c0_49, %c4_50, %c2_51, %c0_52] : memref<1x20x20x4xf32, #tpu.memory_space<vmem>>, vector<1x16x16x4xf32>
    %23 = vector.shape_cast %22 : vector<1x16x16x4xf32> to vector<1x256x4xf32>
    %c0_53 = arith.constant 0 : index
    %c4_54 = arith.constant 4 : index
    %c4_55 = arith.constant 4 : index
    %c0_56 = arith.constant 0 : index
    %24 = vector.load %arg5[%c0_53, %c4_54, %c4_55, %c0_56] : memref<1x20x20x4xf32, #tpu.memory_space<vmem>>, vector<1x16x16x4xf32>
    %25 = vector.shape_cast %24 : vector<1x16x16x4xf32> to vector<1x256x4xf32>
    %26 = tpu.concatenate %9, %11, %13, %15, %17, %19, %21, %23, %25 in 2 : vector<1x256x4xf32>, vector<1x256x4xf32>, vector<1x256x4xf32>, vector<1x256x4xf32>, vector<1x256x4xf32>, vector<1x256x4xf32>, vector<1x256x4xf32>, vector<1x256x4xf32>, vector<1x256x4xf32> -> vector<1x256x36xf32>
    %27 = vector.shape_cast %26 : vector<1x256x36xf32> to vector<256x36xf32>
    %c0_57 = arith.constant 0 : index
    %c0_58 = arith.constant 0 : index
    %28 = vector.load %arg3[%c0_57, %c0_58] : memref<36x128xf32, #tpu.memory_space<vmem>>, vector<36x128xf32>
    %cst_59 = arith.constant dense<0.000000e+00> : vector<256x128xf32>
    %29 = tpu.matmul %27, %28, %cst_59 {dimension_numbers = #tpu.dot_dimension_numbers<[1], [0], [0], [1], [0, 0, 1, 1], [], []>} : vector<256x36xf32>, vector<36x128xf32>, vector<256x128xf32> -> vector<256x128xf32>
    %30 = vector.shape_cast %29 : vector<256x128xf32> to vector<1x16x16x128xf32>
    %c0_60 = arith.constant 0 : index
    %c0_61 = arith.constant 0 : index
    %c0_62 = arith.constant 0 : index
    %c0_63 = arith.constant 0 : index
    %31 = vector.load %arg4[%c0_60, %c0_61, %c0_62, %c0_63] : memref<1x16x16x128xf32, #tpu.memory_space<vmem>>, vector<1x16x16x128xf32>
    tpu.vector_store %arg4[%c0_60, %c0_61, %c0_62, %c0_63], %30 {strides = array<i32>} : memref<1x16x16x128xf32, #tpu.memory_space<vmem>>, vector<1x16x16x128xf32>,
    return
  }
  func.func @transform_0(%arg0: i32, %arg1: i32) -> (i32, i32, i32, i32) {
    %c0_i32 = arith.constant 0 : i32
    %c0_i32_0 = arith.constant 0 : i32
    %c0_i32_1 = arith.constant 0 : i32
    %c0_i32_2 = arith.constant 0 : i32
    return %arg0, %c0_i32, %c0_i32_0, %c0_i32_1 : i32, i32, i32, i32
  }
  func.func @transform_1(%arg0: i32, %arg1: i32) -> (i32, i32) {
    %c0_i32 = arith.constant 0 : i32
    %c0_i32_0 = arith.constant 0 : i32
    return %c0_i32, %arg1 : i32, i32
  }
  func.func @transform_2(%arg0: i32, %arg1: i32) -> (i32, i32, i32, i32) {
    %c0_i32 = arith.constant 0 : i32
    %c0_i32_0 = arith.constant 0 : i32
    %c0_i32_1 = arith.constant 0 : i32
    return %arg0, %c0_i32, %c0_i32_0, %arg1 : i32, i32, i32, i32
  }
}

</mosaic_0001>

<bundles_post_ra>
// kernel: tpu_custom_call.1
= control target key start
LH: loop header
LB: loop body
LE: loop exit
PB: predicated region body
PF: predicated region fallthrough
CT: control target
= control target key end

     0   :  { %7 = vsyncpa [#allocation4], 0  ;;  %s4260_s0 = inlined_call_operand.vmem [shape: f32[2,16,16,4], index: 0, kind: input, shape index: {}]   ;;  %s4261_s1 = inlined_call_operand.vmem [shape: f32[36,128], index: 1, kind: input, shape index: {}]   ;;  %s4262_s2 = inlined_call_operand.hbm [shape: f32[2,16,16,128], index: 2, kind: output, shape index: {}]  }
   0x1   :  { %9 = vsyncpa [#allocation4 + $0x1], 0  ;;  %s2650_s9 = smov 0   ;;  %s2652_s10 = smov 0  }
   0x2   :  { %s2654_s11 = smov 0   ;;  %s2656_s12 = smov 0  }
   0x3   :  { %s2658_s13 = smov 0   ;;  %s2660_s14 = smov 0  }
   0x4 LB: > { %s2327_s15 = sadd.s32 4294967295, %s2622_s14   ;;  %s2328_s16 = sadd.s32 4294967294, %s2622_s14   ;;  %s2622_s14 = sphi %s2660_s14, %s15_s14   ;;  %s2618_s13 = sphi %s2658_s13, %s4456_s13   ;;  %s2614_s12 = sphi %s2656_s12, %s4455_s12   ;;  %s2610_s11 = sphi %s2654_s11, %s4454_s11   ;;  %s2606_s10 = sphi %s2652_s10, %s4453_s10   ;;  %s2602_s9 = sphi %s2650_s9, %s4452_s9  }
   0x5   : > { %s27_s17 = sadd.s32 1, %s2618_s13  ;;  %s88_s18 = sadd.s32 1, %s2610_s11 }
   0x6   : > { %p29_p0 = scmp.ge.s32.totalorder %s27_s17, 2  ;;  %p98_p1 = scmp.ne.s32.totalorder %s2610_s11, %s2606_s10 }
   0x7   : > { %p99_p2 = scmp.eq.s32.totalorder %s2327_s15, 1  ;;  %p104_p3 = scmp.ne.s32.totalorder %s2606_s10, %s2602_s9 }
   0x8   : > { %s4458_s17 = smov (%p29_p0, %s27_s17), 0  ;;  %p105_p5 = scmp.eq.s32.totalorder %s2328_s16, 1 }
   0x9   : > { %p2690_p4 = por %p99_p2, %p98_p1  ;;  %s83_s20 = ssub.s32 %s2618_s13, %s4458_s17 }
   0xa   : > { %p2332_p6 = scmp.ge.s32.totalorder %s2622_s14, 1  ;;  %p86_p7 = scmp.eq.s32.totalorder %s83_s20, 0 }
   0xb   : > { %p2697_p8 = por %p105_p5, %p104_p3  ;;  %p138_p9 = scmp.lt.s32.totalorder %s2622_s14, 3 }
   0xc   : > { %s2703_s22 = scalar_select %p86_p7, %s2610_s11, %s88_s18  }
   0xd   : > { %p139_p10 = pnand %p2332_p6, %p138_p9 }
   0xf   : > { %142 = sbr.rel (%p139_p10) target bundleno = 876 (0x36c), region = 28 }
  0x14   : > { %vm173_vm0 = vcmask 31744   ;;  %vm176_vm1 = vcmask 27648   ;;  %p164_p11 = scmp.lt.s32.totalorder %s2614_s12, 1  ;;  %vm189_vm2 = vcmask 25600   ;;  %v2624_v0 = vmov 0.0   ;;  %s2625_s28 = smov 4  }
  0x15   : > { %178 = vst.msk [vmem:[#allocation2 + $0x18] sm:$0xff] %vm173_vm0, %v2624_v0  ;;  %179 = vst.msk [vmem:[#allocation2 + $0x20] sm:$0xff] %vm173_vm0, %v2624_v0  ;;  %s2626_s29 = smov 8   ;;  %s2627_s30 = smov 12   ;;  %vm1631_vm3 = vcmask 64512   ;;  %vm1964_vm4 = vcmask 1043456  }
  0x16   : > { %174 = vst.msk [vmem:[#allocation2] sm:$0xff] %vm173_vm0, %v2624_v0  ;;  %175 = vst.msk [vmem:[#allocation2 + $0x8] sm:$0xff] %vm173_vm0, %v2624_v0  ;;  %s165_s23 = scalar_select %p164_p11, %s2614_s12, 1  ;;  %vm1664_vm5 = vcmask 97280   ;;  %vm1697_vm6 = vcmask 130048   ;;  %vm1730_vm7 = vcmask 162816  }
  0x17   : > { %182 = vst.msk [vmem:[#allocation2 + $0x1b0] sm:$0xff] %vm173_vm0, %v2624_v0  ;;  %183 = vst.msk [vmem:[#allocation2 + $0x1b8] sm:$0xff] %vm173_vm0, %v2624_v0  ;;  %s2628_s3 = smov 16   ;;  %s2629_s4 = smov 20   ;;  %vm1763_vm8 = vcmask 195584   ;;  %vm1796_vm9 = vcmask 228352  }
  0x18   : > { %185 = vst.msk [vmem:[#allocation2 + $0x1c8] sm:$0xff] %vm173_vm0, %v2624_v0  ;;  %186 = vst.msk [vmem:[#allocation2 + $0x1d0] sm:$0xff] %vm173_vm0, %v2624_v0  ;;  %s2374_s24 = sshll.u32 %s165_s23, 8  ;;  %s2630_s5 = smov 24   ;;  %vm1829_vm10 = vcmask 261120   ;;  %vm1867_vm11 = vcmask 293888  }
  0x19   : > { %180 = vst.msk [vmem:[#allocation2 + $0x28] sm:$0xf] %vm176_vm1, %v2624_v0  ;;  %177 = vst.msk [vmem:[#allocation2 + $0x10] sm:$0xf] %vm176_vm1, %v2624_v0  ;;  %s2752_s27 = scalar_lea.vmem %s4260_s0, %s2374_s24  ;;  %s2631_s16 = smov 28  }
  0x1a   : > { %184 = vst.msk [vmem:[#allocation2 + $0x1c0] sm:$0xf] %vm176_vm1, %v2624_v0  ;;  %187 = vst.msk [vmem:[#allocation2 + $0x1d8] sm:$0xf] %vm176_vm1, %v2624_v0  ;;  %v223_v1 = vld [vmem:[%s2752_s27 + $0x8] sm:$0xff]  ;;  %v222_v2 = vld [vmem:[%s2752_s27] sm:$0xff] }
  0x1b   : > { %206 = vst.msk [vmem:[#allocation2 + $0x42] sm:$0x3] %vm189_vm2, %v2624_v0  ;;  %190 = vst.msk [vmem:[#allocation2 + $0x30] sm:$0x3] %vm189_vm2, %v2624_v0  ;;  %v225_v3 = vld [vmem:[%s2752_s27 + $0x18] sm:$0xff]  ;;  %v224_v4 = vld [vmem:[%s2752_s27 + $0x10] sm:$0xff] }
  0x1c   : > { %191 = vst.msk [vmem:[#allocation2 + $0x48] sm:$0x3] %vm189_vm2, %v2624_v0  ;;  %192 = vst.msk [vmem:[#allocation2 + $0x60] sm:$0x3] %vm189_vm2, %v2624_v0  ;;  %v227_v5 = vld [vmem:[%s2752_s27 + $0x28] sm:$0xff]  ;;  %v226_v6 = vld [vmem:[%s2752_s27 + $0x20] sm:$0xff] }
  0x1d   : > { %193 = vst.msk [vmem:[#allocation2 + $0x78] sm:$0x3] %vm189_vm2, %v2624_v0  ;;  %194 = vst.msk [vmem:[#allocation2 + $0x90] sm:$0x3] %vm189_vm2, %v2624_v0  ;;  %v320_v7 = vld [vmem:[#allocation2 + $0x1a] sm:$0xff]  ;;  %v318_v8 = vld [vmem:[#allocation2 + $0x2] sm:$0xff] }
  0x1e   : > { %195 = vst.msk [vmem:[#allocation2 + $0xa8] sm:$0x3] %vm189_vm2, %v2624_v0  ;;  %196 = vst.msk [vmem:[#allocation2 + $0xc0] sm:$0x3] %vm189_vm2, %v2624_v0  ;;  %611 = vrot.lane.b32.xlu1 %v320_v7, %s2625_s28  ;;  %607 = vrot.lane.b32.xlu0 %v318_v8, %s2625_s28  ;;  %v229_v11 = vld [vmem:[%s2752_s27 + $0x38] sm:$0xff]  ;;  %v228_v12 = vld [vmem:[%s2752_s27 + $0x30] sm:$0xff] }
  0x1f   : > { %197 = vst.msk [vmem:[#allocation2 + $0xd8] sm:$0x3] %vm189_vm2, %v2624_v0  ;;  %198 = vst.msk [vmem:[#allocation2 + $0xf0] sm:$0x3] %vm189_vm2, %v2624_v0  ;;  %v231_v13 = vld [vmem:[%s2752_s27 + $0x48] sm:$0xff]  ;;  %v230_v14 = vld [vmem:[%s2752_s27 + $0x40] sm:$0xff] }
  0x20   : > { %199 = vst.msk [vmem:[#allocation2 + $0x108] sm:$0x3] %vm189_vm2, %v2624_v0  ;;  %200 = vst.msk [vmem:[#allocation2 + $0x120] sm:$0x3] %vm189_vm2, %v2624_v0  ;;  %v321_v9 = vld [vmem:[#allocation2 + $0x22] sm:$0xff]  ;;  %v319_v10 = vld [vmem:[#allocation2 + $0xa] sm:$0xff] }
  0x21   : > { %201 = vst.msk [vmem:[#allocation2 + $0x138] sm:$0x3] %vm189_vm2, %v2624_v0  ;;  %202 = vst.msk [vmem:[#allocation2 + $0x150] sm:$0x3] %vm189_vm2, %v2624_v0  ;;  %v233_v15 = vld [vmem:[%s2752_s27 + $0x58] sm:$0xff]  ;;  %v232_v16 = vld [vmem:[%s2752_s27 + $0x50] sm:$0xff] }
  0x22   : > { %203 = vst.msk [vmem:[#allocation2 + $0x168] sm:$0x3] %vm189_vm2, %v2624_v0  ;;  %204 = vst.msk [vmem:[#allocation2 + $0x180] sm:$0x3] %vm189_vm2, %v2624_v0  ;;  %v235_v17 = vld [vmem:[%s2752_s27 + $0x68] sm:$0xff]  ;;  %v234_v18 = vld [vmem:[%s2752_s27 + $0x60] sm:$0xff]  ;;  %613 = vrot.lane.b32.xlu1 %v321_v9, %s2625_s28  ;;  %609 = vrot.lane.b32.xlu0 %v319_v10, %s2625_s28 }
  0x23   : > { %205 = vst.msk [vmem:[#allocation2 + $0x198] sm:$0x3] %vm189_vm2, %v2624_v0  ;;  %207 = vst.msk [vmem:[#allocation2 + $0x5a] sm:$0x3] %vm189_vm2, %v2624_v0  ;;  %v237_v19 = vld [vmem:[%s2752_s27 + $0x78] sm:$0xff]  ;;  %v236_v20 = vld [vmem:[%s2752_s27 + $0x70] sm:$0xff] }
  0x24   : > { %208 = vst.msk [vmem:[#allocation2 + $0x72] sm:$0x3] %vm189_vm2, %v2624_v0  ;;  %209 = vst.msk [vmem:[#allocation2 + $0x8a] sm:$0x3] %vm189_vm2, %v2624_v0  ;;  %v239_v21 = vld [vmem:[%s2752_s27 + $0x88] sm:$0xff]  ;;  %v238_v22 = vld [vmem:[%s2752_s27 + $0x80] sm:$0xff] }
  0x25   : > { %210 = vst.msk [vmem:[#allocation2 + $0xa2] sm:$0x3] %vm189_vm2, %v2624_v0  ;;  %211 = vst.msk [vmem:[#allocation2 + $0xba] sm:$0x3] %vm189_vm2, %v2624_v0  ;;  %v241_v23 = vld [vmem:[%s2752_s27 + $0x98] sm:$0xff]  ;;  %v240_v26 = vld [vmem:[%s2752_s27 + $0x90] sm:$0xff] }
  0x26   : > { %212 = vst.msk [vmem:[#allocation2 + $0xd2] sm:$0x3] %vm189_vm2, %v2624_v0  ;;  %213 = vst.msk [vmem:[#allocation2 + $0xea] sm:$0x3] %vm189_vm2, %v2624_v0  ;;  %v243_v27 = vld [vmem:[%s2752_s27 + $0xa8] sm:$0xff]  ;;  %v242_v28 = vld [vmem:[%s2752_s27 + $0xa0] sm:$0xff] }
  0x27   : > { %214 = vst.msk [vmem:[#allocation2 + $0x102] sm:$0x3] %vm189_vm2, %v2624_v0  ;;  %215 = vst.msk [vmem:[#allocation2 + $0x11a] sm:$0x3] %vm189_vm2, %v2624_v0  ;;  %v245_v29 = vld [vmem:[%s2752_s27 + $0xb8] sm:$0xff]  ;;  %v244_v34 = vld [vmem:[%s2752_s27 + $0xb0] sm:$0xff] }
  0x28   : > { %216 = vst.msk [vmem:[#allocation2 + $0x132] sm:$0x3] %vm189_vm2, %v2624_v0  ;;  %217 = vst.msk [vmem:[#allocation2 + $0x14a] sm:$0x3] %vm189_vm2, %v2624_v0  ;;  %v247_v35 = vld [vmem:[%s2752_s27 + $0xc8] sm:$0xff]  ;;  %v246_v36 = vld [vmem:[%s2752_s27 + $0xc0] sm:$0xff] }
  0x29   : > { %218 = vst.msk [vmem:[#allocation2 + $0x162] sm:$0x3] %vm189_vm2, %v2624_v0  ;;  %219 = vst.msk [vmem:[#allocation2 + $0x17a] sm:$0x3] %vm189_vm2, %v2624_v0  ;;  %v249_v37 = vld [vmem:[%s2752_s27 + $0xd8] sm:$0xff]  ;;  %v248_v38 = vld [vmem:[%s2752_s27 + $0xd0] sm:$0xff] }
  0x2a   : > { %220 = vst.msk [vmem:[#allocation2 + $0x192] sm:$0x3] %vm189_vm2, %v2624_v0  ;;  %221 = vst.msk [vmem:[#allocation2 + $0x1aa] sm:$0x3] %vm189_vm2, %v2624_v0  ;;  %v250_v55 = vld [vmem:[%s2752_s27 + $0xe0] sm:$0xff]  ;;  %v251_v56 = vld [vmem:[%s2752_s27 + $0xe8] sm:$0xff] }
  0x2b   : > { %255 = vst.msk [vmem:[#allocation2 + $0x3a] sm:$0xff] %vm173_vm0, %v223_v1  ;;  %254 = vst.msk [vmem:[#allocation2 + $0x32] sm:$0xff] %vm173_vm0, %v222_v2  ;;  %v252_v59 = vld [vmem:[%s2752_s27 + $0xf0] sm:$0xff]  ;;  %v253_v60 = vld [vmem:[%s2752_s27 + $0xf8] sm:$0xff]  ;;  %s2632_s27 = smov 32  }
  0x2c   : > { %257 = vst.msk [vmem:[#allocation2 + $0x52] sm:$0xff] %vm173_vm0, %v225_v3  ;;  %256 = vst.msk [vmem:[#allocation2 + $0x4a] sm:$0xff] %vm173_vm0, %v224_v4  ;;  %v351_v1 = vld [vmem:[#allocation2 + $0xc] sm:$0xff]  ;;  %v350_v2 = vld [vmem:[#allocation2 + $0x4] sm:$0xff] }
  0x2d   : > { %259 = vst.msk [vmem:[#allocation2 + $0x6a] sm:$0xff] %vm173_vm0, %v227_v5  ;;  %258 = vst.msk [vmem:[#allocation2 + $0x62] sm:$0xff] %vm173_vm0, %v226_v6  ;;  %v353_v3 = vld [vmem:[#allocation2 + $0x24] sm:$0xff]  ;;  %v352_v4 = vld [vmem:[#allocation2 + $0x1c] sm:$0xff] }
  0x2e   : > { %261 = vst.msk [vmem:[#allocation2 + $0x82] sm:$0xff] %vm173_vm0, %v229_v11  ;;  %260 = vst.msk [vmem:[#allocation2 + $0x7a] sm:$0xff] %vm173_vm0, %v228_v12 }
  0x2f   : > { %263 = vst.msk [vmem:[#allocation2 + $0x9a] sm:$0xff] %vm173_vm0, %v231_v13  ;;  %262 = vst.msk [vmem:[#allocation2 + $0x92] sm:$0xff] %vm173_vm0, %v230_v14 }
  0x30   : > { %265 = vst.msk [vmem:[#allocation2 + $0xb2] sm:$0xff] %vm173_vm0, %v233_v15  ;;  %264 = vst.msk [vmem:[#allocation2 + $0xaa] sm:$0xff] %vm173_vm0, %v232_v16 }
  0x31   : > { %267 = vst.msk [vmem:[#allocation2 + $0xca] sm:$0xff] %vm173_vm0, %v235_v17  ;;  %266 = vst.msk [vmem:[#allocation2 + $0xc2] sm:$0xff] %vm173_vm0, %v234_v18 }
  0x32   : > { %269 = vst.msk [vmem:[#allocation2 + $0xe2] sm:$0xff] %vm173_vm0, %v237_v19  ;;  %268 = vst.msk [vmem:[#allocation2 + $0xda] sm:$0xff] %vm173_vm0, %v236_v20  ;;  %v2794_v24 = vld [vmem:[#allocation2 + $0x3a] sm:$0xff]  ;;  %v2796_v25 = vld [vmem:[#allocation2 + $0x32] sm:$0xff] }
  0x33   : > { %271 = vst.msk [vmem:[#allocation2 + $0xfa] sm:$0xff] %vm173_vm0, %v239_v21  ;;  %270 = vst.msk [vmem:[#allocation2 + $0xf2] sm:$0xff] %vm173_vm0, %v238_v22  ;;  %617 = vrot.lane.b32.xlu1 %v2794_v24, %s2625_s28  ;;  %615 = vrot.lane.b32.xlu0 %v2796_v25, %s2625_s28  ;;  %v2811_v30 = vld [vmem:[#allocation2 + $0x52] sm:$0xff]  ;;  %v2813_v31 = vld [vmem:[#allocation2 + $0x4a] sm:$0xff] }
  0x34   : > { %273 = vst.msk [vmem:[#allocation2 + $0x112] sm:$0xff] %vm173_vm0, %v241_v23  ;;  %272 = vst.msk [vmem:[#allocation2 + $0x10a] sm:$0xff] %vm173_vm0, %v240_v26  ;;  %v2820_v32 = vld [vmem:[#allocation2 + $0x6a] sm:$0xff]  ;;  %v2822_v33 = vld [vmem:[#allocation2 + $0x62] sm:$0xff] }
  0x35   : > { %275 = vst.msk [vmem:[#allocation2 + $0x12a] sm:$0xff] %vm173_vm0, %v243_v27  ;;  %274 = vst.msk [vmem:[#allocation2 + $0x122] sm:$0xff] %vm173_vm0, %v242_v28  ;;  %v2838_v39 = vld [vmem:[#allocation2 + $0x82] sm:$0xff]  ;;  %v2840_v40 = vld [vmem:[#allocation2 + $0x7a] sm:$0xff] }
  0x36   : > { %277 = vst.msk [vmem:[#allocation2 + $0x142] sm:$0xff] %vm173_vm0, %v245_v29  ;;  %276 = vst.msk [vmem:[#allocation2 + $0x13a] sm:$0xff] %vm173_vm0, %v244_v34  ;;  %v2846_v41 = vld [vmem:[#allocation2 + $0x9a] sm:$0xff]  ;;  %v2848_v42 = vld [vmem:[#allocation2 + $0x92] sm:$0xff] }
  0x37   : > { %621 = vrot.lane.b32.xlu1 %v2811_v30, %s2625_s28  ;;  %619 = vrot.lane.b32.xlu0 %v2813_v31, %s2625_s28  ;;  %279 = vst.msk [vmem:[#allocation2 + $0x15a] sm:$0xff] %vm173_vm0, %v247_v35  ;;  %278 = vst.msk [vmem:[#allocation2 + $0x152] sm:$0xff] %vm173_vm0, %v246_v36  ;;  %v2854_v43 = vld [vmem:[#allocation2 + $0xb2] sm:$0xff]  ;;  %v2856_v44 = vld [vmem:[#allocation2 + $0xaa] sm:$0xff] }
  0x38   : > { %281 = vst.msk [vmem:[#allocation2 + $0x172] sm:$0xff] %vm173_vm0, %v249_v37  ;;  %280 = vst.msk [vmem:[#allocation2 + $0x16a] sm:$0xff] %vm173_vm0, %v248_v38  ;;  %v2862_v45 = vld [vmem:[#allocation2 + $0xca] sm:$0xff]  ;;  %v2864_v46 = vld [vmem:[#allocation2 + $0xc2] sm:$0xff] }
  0x39   : > { %v2870_v47 = vld [vmem:[#allocation2 + $0xe2] sm:$0xff]  ;;  %v2872_v48 = vld [vmem:[#allocation2 + $0xda] sm:$0xff]  ;;  %282 = vst.msk [vmem:[#allocation2 + $0x182] sm:$0xff] %vm173_vm0, %v250_v55  ;;  %283 = vst.msk [vmem:[#allocation2 + $0x18a] sm:$0xff] %vm173_vm0, %v251_v56 }
  0x3a   : > { %v2878_v49 = vld [vmem:[#allocation2 + $0xfa] sm:$0xff]  ;;  %v2880_v50 = vld [vmem:[#allocation2 + $0xf2] sm:$0xff]  ;;  %284 = vst.msk [vmem:[#allocation2 + $0x19a] sm:$0xff] %vm173_vm0, %v252_v59  ;;  %285 = vst.msk [vmem:[#allocation2 + $0x1a2] sm:$0xff] %vm173_vm0, %v253_v60 }
  0x3b   : > { %625 = vrot.lane.b32.xlu1 %v2820_v32, %s2625_s28  ;;  %623 = vrot.lane.b32.xlu0 %v2822_v33, %s2625_s28  ;;  %v2886_v51 = vld [vmem:[#allocation2 + $0x112] sm:$0xff]  ;;  %v2888_v52 = vld [vmem:[#allocation2 + $0x10a] sm:$0xff]  ;;  %v2926_v5 = vld [vmem:[#allocation2 + $0x3c] sm:$0xff] }
  0x3c   : > { %v2894_v53 = vld [vmem:[#allocation2 + $0x12a] sm:$0xff]  ;;  %v2896_v54 = vld [vmem:[#allocation2 + $0x122] sm:$0xff]  ;;  %v2928_v6 = vld [vmem:[#allocation2 + $0x34] sm:$0xff] }
  0x3d   : > { %v2906_v57 = vld [vmem:[#allocation2 + $0x142] sm:$0xff]  ;;  %v2908_v58 = vld [vmem:[#allocation2 + $0x13a] sm:$0xff]  ;;  %v2936_v8 = vld [vmem:[#allocation2 + $0x4c] sm:$0xff] }
  0x3e   : > { %4308 = vst [vmem:[#allocation6_spill] sm:$0xff] %v2906_v57  ;;  %4309 = vst [vmem:[#allocation7_spill] sm:$0xff] %v2908_v58  ;;  %v347_v61 = vld [vmem:[#allocation2 + $0x15a] sm:$0xff]  ;;  %v346_v62 = vld [vmem:[#allocation2 + $0x152] sm:$0xff] }
  0x3f   : > { %629 = vrot.lane.b32.xlu1 %v2838_v39, %s2625_s28  ;;  %627 = vrot.lane.b32.xlu0 %v2840_v40, %s2625_s28  ;;  %v349_v63 = vld [vmem:[#allocation2 + $0x172] sm:$0xff]  ;;  %v348_v0 = vld [vmem:[#allocation2 + $0x16a] sm:$0xff]  ;;  %v2952_v12 = vld [vmem:[#allocation2 + $0x7c] sm:$0xff] }
  0x40   : > { %v2934_v7 = vld [vmem:[#allocation2 + $0x54] sm:$0xff]  ;;  %v2942_v9 = vld [vmem:[#allocation2 + $0x6c] sm:$0xff]  ;;  %v2944_v10 = vld [vmem:[#allocation2 + $0x64] sm:$0xff]  ;;  %4313 = vst [vmem:[#allocation11_spill] sm:$0xff] %v2952_v12 }
  0x41   : > { %4310 = vst [vmem:[#allocation8_spill] sm:$0xff] %v2934_v7  ;;  %4311 = vst [vmem:[#allocation9_spill] sm:$0xff] %v2942_v9  ;;  %v2950_v11 = vld [vmem:[#allocation2 + $0x84] sm:$0xff]  ;;  %v363_v13 = vld [vmem:[#allocation2 + $0x9c] sm:$0xff] }
  0x42   : > { %4312 = vst [vmem:[#allocation10_spill] sm:$0xff] %v2950_v11  ;;  %v2958_v14 = vld [vmem:[#allocation2 + $0x94] sm:$0xff]  ;;  %v364_v16 = vld [vmem:[#allocation2 + $0xac] sm:$0xff]  ;;  %v366_v18 = vld [vmem:[#allocation2 + $0xc4] sm:$0xff] }
  0x43   : > { %633 = vrot.lane.b32.xlu1 %v2846_v41, %s2625_s28  ;;  %631 = vrot.lane.b32.xlu0 %v2848_v42, %s2625_s28  ;;  %4314 = vst [vmem:[#allocation12_spill] sm:$0xff] %v2958_v14  ;;  %v365_v15 = vld [vmem:[#allocation2 + $0xb4] sm:$0xff]  ;;  %v367_v17 = vld [vmem:[#allocation2 + $0xcc] sm:$0xff]  ;;  %v369_v19 = vld [vmem:[#allocation2 + $0xe4] sm:$0xff] }
  0x44   : > { %v368_v20 = vld [vmem:[#allocation2 + $0xdc] sm:$0xff]  ;;  %v2971_v22 = vld [vmem:[#allocation2 + $0xf4] sm:$0xff]  ;;  %v2979_v26 = vld [vmem:[#allocation2 + $0x10c] sm:$0xff] }
  0x45   : > { %v2969_v21 = vld [vmem:[#allocation2 + $0xfc] sm:$0xff]  ;;  %v2977_v23 = vld [vmem:[#allocation2 + $0x114] sm:$0xff]  ;;  %v2985_v27 = vld [vmem:[#allocation2 + $0x12c] sm:$0xff] }
  0x46   : > { %4315 = vst [vmem:[#allocation13_spill] sm:$0xff] %v2977_v23  ;;  %4316 = vst [vmem:[#allocation14_spill] sm:$0xff] %v2985_v27  ;;  %v2987_v28 = vld [vmem:[#allocation2 + $0x124] sm:$0xff]  ;;  %v2995_v34 = vld [vmem:[#allocation2 + $0x13c] sm:$0xff] }
  0x47   : > { %637 = vrot.lane.b32.xlu1 %v2854_v43, %s2625_s28  ;;  %635 = vrot.lane.b32.xlu0 %v2856_v44, %s2625_s28  ;;  %v2993_v29 = vld [vmem:[#allocation2 + $0x144] sm:$0xff]  ;;  %4318 = vst [vmem:[#allocation16_spill] sm:$0xff] %v2995_v34  ;;  %v3005_v37 = vld [vmem:[#allocation2 + $0x15c] sm:$0xff]  ;;  %v3007_v38 = vld [vmem:[#allocation2 + $0x154] sm:$0xff] }
  0x48   : > { %4317 = vst [vmem:[#allocation15_spill] sm:$0xff] %v2993_v29  ;;  %4321 = vst [vmem:[#allocation19_spill] sm:$0xff] %v3005_v37  ;;  %v381_v59 = vld [vmem:[#allocation2 + $0x174] sm:$0xff]  ;;  %v380_v60 = vld [vmem:[#allocation2 + $0x16c] sm:$0xff] }
  0x49   : > { %4322 = vst [vmem:[#allocation20_spill] sm:$0xff] %v3007_v38 }
  0x4b   : > { %641 = vrot.lane.b32.xlu1 %v2862_v45, %s2625_s28  ;;  %639 = vrot.lane.b32.xlu0 %v2864_v46, %s2625_s28 }
  0x4f   : > { %645 = vrot.lane.b32.xlu1 %v2870_v47, %s2625_s28  ;;  %643 = vrot.lane.b32.xlu0 %v2872_v48, %s2625_s28 }
  0x53   : > { %649 = vrot.lane.b32.xlu1 %v2878_v49, %s2625_s28  ;;  %647 = vrot.lane.b32.xlu0 %v2880_v50, %s2625_s28 }
  0x57   : > { %653 = vrot.lane.b32.xlu1 %v2886_v51, %s2625_s28  ;;  %651 = vrot.lane.b32.xlu0 %v2888_v52, %s2625_s28 }
  0x5b   : > { %657 = vrot.lane.b32.xlu1 %v2894_v53, %s2625_s28  ;;  %655 = vrot.lane.b32.xlu0 %v2896_v54, %s2625_s28 }
  0x5f   : > { %661 = vrot.lane.b32.xlu1 %v2906_v57, %s2625_s28  ;;  %659 = vrot.lane.b32.xlu0 %v2908_v58, %s2625_s28  ;;  %v3101_v58 = vld [vmem:[#allocation2 + $0xc0] sm:$0xff] }
  0x60   : > { %4338 = vst [vmem:[#allocation36_spill] sm:$0xff] %v3101_v58 }
  0x63   : > { %665 = vrot.lane.b32.xlu1 %v347_v61, %s2625_s28  ;;  %663 = vrot.lane.b32.xlu0 %v346_v62, %s2625_s28 }
  0x67   : > { %669 = vrot.lane.b32.xlu1 %v349_v63, %s2625_s28  ;;  %667 = vrot.lane.b32.xlu0 %v348_v0, %s2625_s28  ;;  %s161_s28 = sand.u32 1, %s2606_s10  }
  0x6b   : > { %737 = vrot.lane.b32.xlu1 %v351_v1, %s2626_s29  ;;  %735 = vrot.lane.b32.xlu0 %v350_v2, %s2626_s29  ;;  %v3027_v1 = vld [vmem:[#allocation2 + $0x38] sm:$0xff]  ;;  %v3029_v2 = vld [vmem:[#allocation2 + $0x30] sm:$0xff] }
  0x6f   : > { %741 = vrot.lane.b32.xlu1 %v353_v3, %s2626_s29  ;;  %739 = vrot.lane.b32.xlu0 %v352_v4, %s2626_s29 }
  0x73   : > { %745 = vrot.lane.b32.xlu1 %v2926_v5, %s2626_s29  ;;  %743 = vrot.lane.b32.xlu0 %v2928_v6, %s2626_s29 }
  0x77   : > { %749 = vrot.lane.b32.xlu1 %v2934_v7, %s2626_s29  ;;  %747 = vrot.lane.b32.xlu0 %v2936_v8, %s2626_s29 }
  0x7b   : > { %753 = vrot.lane.b32.xlu1 %v2942_v9, %s2626_s29  ;;  %751 = vrot.lane.b32.xlu0 %v2944_v10, %s2626_s29  ;;  %v3171_v9 = vld [vmem:[#allocation2 + $0x158] sm:$0xff] }
  0x7c   : > { %4351 = vst [vmem:[#allocation49_spill] sm:$0xff] %v3171_v9 }
  0x7f   : > { %757 = vrot.lane.b32.xlu1 %v2950_v11, %s2626_s29  ;;  %755 = vrot.lane.b32.xlu0 %v2952_v12, %s2626_s29  ;;  %v3087_v11 = vld [vmem:[#allocation2 + $0xb0] sm:$0xff]  ;;  %v3099_v12 = vld [vmem:[#allocation2 + $0xc8] sm:$0xff] }
  0x80   : > { %4333 = vst [vmem:[#allocation31_spill] sm:$0xff] %v3087_v11  ;;  %4337 = vst [vmem:[#allocation35_spill] sm:$0xff] %v3099_v12 }
  0x83   : > { %761 = vrot.lane.b32.xlu1 %v363_v13, %s2626_s29  ;;  %759 = vrot.lane.b32.xlu0 %v2958_v14, %s2626_s29  ;;  %v3039_v13 = vld [vmem:[#allocation2 + $0x50] sm:$0xff] }
  0x87   : > { %765 = vrot.lane.b32.xlu1 %v365_v15, %s2626_s29  ;;  %763 = vrot.lane.b32.xlu0 %v364_v16, %s2626_s29  ;;  %v3041_v15 = vld [vmem:[#allocation2 + $0x48] sm:$0xff] }
  0x8b   : > { %769 = vrot.lane.b32.xlu1 %v367_v17, %s2626_s29  ;;  %767 = vrot.lane.b32.xlu0 %v366_v18, %s2626_s29  ;;  %v3051_v18 = vld [vmem:[#allocation2 + $0x68] sm:$0xff] }
  0x8f   : > { %773 = vrot.lane.b32.xlu1 %v369_v19, %s2626_s29  ;;  %771 = vrot.lane.b32.xlu0 %v368_v20, %s2626_s29  ;;  %v3053_v19 = vld [vmem:[#allocation2 + $0x60] sm:$0xff] }
  0x90   : > { %v2997_v35 = vpop.permute.xlu1 %611  ;;  %v2999_v36 = vpop.permute.xlu0 %607 }
  0x91   : > { %4319 = vst [vmem:[#allocation17_spill] sm:$0xff] %v2997_v35  ;;  %4320 = vst [vmem:[#allocation18_spill] sm:$0xff] %v2999_v36  ;;  %v3075_v36 = vld [vmem:[#allocation2 + $0x98] sm:$0xff] }
  0x92   : > { %4329 = vst [vmem:[#allocation27_spill] sm:$0xff] %v3075_v36 }
  0x93   : > { %777 = vrot.lane.b32.xlu1 %v2969_v21, %s2626_s29  ;;  %775 = vrot.lane.b32.xlu0 %v2971_v22, %s2626_s29 }
  0x94   : > { %v3009_v55 = vpop.permute.xlu1 %613  ;;  %v3011_v56 = vpop.permute.xlu0 %609 }
  0x95   : > { %4323 = vst [vmem:[#allocation21_spill] sm:$0xff] %v3009_v55  ;;  %4324 = vst [vmem:[#allocation22_spill] sm:$0xff] %v3011_v56  ;;  %v3065_v55 = vld [vmem:[#allocation2 + $0x78] sm:$0xff] }
  0x97   : > { %781 = vrot.lane.b32.xlu1 %v2977_v23, %s2626_s29  ;;  %779 = vrot.lane.b32.xlu0 %v2979_v26, %s2626_s29 }
  0x9b   : > { %785 = vrot.lane.b32.xlu1 %v2985_v27, %s2626_s29  ;;  %783 = vrot.lane.b32.xlu0 %v2987_v28, %s2626_s29  ;;  %v3173_v27 = vld [vmem:[#allocation2 + $0x150] sm:$0xff] }
  0x9c   : > { %4352 = vst [vmem:[#allocation50_spill] sm:$0xff] %v3173_v27 }
  0x9f   : > { %789 = vrot.lane.b32.xlu1 %v2993_v29, %s2626_s29  ;;  %787 = vrot.lane.b32.xlu0 %v2995_v34, %s2626_s29  ;;  %v3089_v29 = vld [vmem:[#allocation2 + $0xa8] sm:$0xff] }
  0xa0   : > { %4334 = vst [vmem:[#allocation32_spill] sm:$0xff] %v3089_v29 }
  0xa3   : > { %793 = vrot.lane.b32.xlu1 %v3005_v37, %s2626_s29  ;;  %791 = vrot.lane.b32.xlu0 %v3007_v38, %s2626_s29  ;;  %v3077_v37 = vld [vmem:[#allocation2 + $0x90] sm:$0xff] }
  0xa4   : > { %4330 = vst [vmem:[#allocation28_spill] sm:$0xff] %v3077_v37 }
  0xa5   : > { %v3017_v61 = vpop.permute.xlu1 %617  ;;  %v3019_v62 = vpop.permute.xlu0 %615 }
  0xa7   : > { %797 = vrot.lane.b32.xlu1 %v381_v59, %s2626_s29  ;;  %795 = vrot.lane.b32.xlu0 %v380_v60, %s2626_s29  ;;  %v3063_v60 = vld [vmem:[#allocation2 + $0x80] sm:$0xff] }
  0xa9   : > { %v3023_v63 = vpop.permute.xlu1 %621  ;;  %v3025_v0 = vpop.permute.xlu0 %619 }
  0xab   : > { %865 = vrot.lane.b32.xlu1 %v3027_v1, %s2627_s30  ;;  %863 = vrot.lane.b32.xlu0 %v3029_v2, %s2627_s30 }
  0xad   : > { %v3035_v3 = vpop.permute.xlu1 %625  ;;  %v3037_v4 = vpop.permute.xlu0 %623 }
  0xaf   : > { %869 = vrot.lane.b32.xlu1 %v3039_v13, %s2627_s30  ;;  %867 = vrot.lane.b32.xlu0 %v3041_v15, %s2627_s30 }
  0xb1   : > { %v3047_v16 = vpop.permute.xlu1 %629  ;;  %v3049_v17 = vpop.permute.xlu0 %627 }
  0xb3   : > { %873 = vrot.lane.b32.xlu1 %v3051_v18, %s2627_s30  ;;  %871 = vrot.lane.b32.xlu0 %v3053_v19, %s2627_s30 }
  0xb5   : > { %v3059_v20 = vpop.permute.xlu1 %633  ;;  %v3061_v59 = vpop.permute.xlu0 %631 }
  0xb6   : > { %4325 = vst [vmem:[#allocation23_spill] sm:$0xff] %v3059_v20  ;;  %4326 = vst [vmem:[#allocation24_spill] sm:$0xff] %v3061_v59  ;;  %v3149_v59 = vld [vmem:[#allocation2 + $0x120] sm:$0xff]  ;;  %v3161_v20 = vld [vmem:[#allocation2 + $0x138] sm:$0xff] }
  0xb7   : > { %877 = vrot.lane.b32.xlu1 %v3063_v60, %s2627_s30  ;;  %875 = vrot.lane.b32.xlu0 %v3065_v55, %s2627_s30  ;;  %4348 = vst [vmem:[#allocation46_spill] sm:$0xff] %v3161_v20 }
  0xb9   : > { %v3071_v35 = vpop.permute.xlu1 %637  ;;  %v3073_v56 = vpop.permute.xlu0 %635 }
  0xba   : > { %4327 = vst [vmem:[#allocation25_spill] sm:$0xff] %v3071_v35  ;;  %4328 = vst [vmem:[#allocation26_spill] sm:$0xff] %v3073_v56  ;;  %v3111_v56 = vld [vmem:[#allocation2 + $0xe0] sm:$0xff]  ;;  %v3135_v35 = vld [vmem:[#allocation2 + $0x110] sm:$0xff] }
  0xbb   : > { %881 = vrot.lane.b32.xlu1 %v3075_v36, %s2627_s30  ;;  %879 = vrot.lane.b32.xlu0 %v3077_v37, %s2627_s30  ;;  %4339 = vst [vmem:[#allocation37_spill] sm:$0xff] %v3111_v56  ;;  %v3147_v37 = vld [vmem:[#allocation2 + $0x128] sm:$0xff]  ;;  %v3159_v36 = vld [vmem:[#allocation2 + $0x140] sm:$0xff] }
  0xbc   : > { %4347 = vst [vmem:[#allocation45_spill] sm:$0xff] %v3159_v36 }
  0xbd   : > { %v3083_v38 = vpop.permute.xlu1 %641  ;;  %v3085_v14 = vpop.permute.xlu0 %639 }
  0xbe   : > { %4331 = vst [vmem:[#allocation29_spill] sm:$0xff] %v3083_v38  ;;  %4332 = vst [vmem:[#allocation30_spill] sm:$0xff] %v3085_v14 }
  0xbf   : > { %885 = vrot.lane.b32.xlu1 %v3087_v11, %s2627_s30  ;;  %883 = vrot.lane.b32.xlu0 %v3089_v29, %s2627_s30  ;;  %v3113_v29 = vld [vmem:[#allocation2 + $0xd8] sm:$0xff] }
  0xc0   : > { %4340 = vst [vmem:[#allocation38_spill] sm:$0xff] %v3113_v29 }
  0xc1   : > { %v3095_v34 = vpop.permute.xlu1 %645  ;;  %v3097_v57 = vpop.permute.xlu0 %643 }
  0xc2   : > { %4335 = vst [vmem:[#allocation33_spill] sm:$0xff] %v3095_v34  ;;  %4336 = vst [vmem:[#allocation34_spill] sm:$0xff] %v3097_v57 }
  0xc3   : > { %889 = vrot.lane.b32.xlu1 %v3099_v12, %s2627_s30  ;;  %887 = vrot.lane.b32.xlu0 %v3101_v58, %s2627_s30  ;;  %v3123_v12 = vld [vmem:[#allocation2 + $0xf8] sm:$0xff]  ;;  %v3125_v58 = vld [vmem:[#allocation2 + $0xf0] sm:$0xff] }
  0xc5   : > { %v3107_v38 = vpop.permute.xlu1 %649  ;;  %v3109_v14 = vpop.permute.xlu0 %647 }
  0xc7   : > { %893 = vrot.lane.b32.xlu1 %v3111_v56, %s2627_s30  ;;  %891 = vrot.lane.b32.xlu0 %v3113_v29, %s2627_s30  ;;  %v3137_v29 = vld [vmem:[#allocation2 + $0x108] sm:$0xff] }
  0xc9   : > { %v3119_v34 = vpop.permute.xlu1 %653  ;;  %v3121_v57 = vpop.permute.xlu0 %651 }
  0xcb   : > { %897 = vrot.lane.b32.xlu1 %v3123_v12, %s2627_s30  ;;  %895 = vrot.lane.b32.xlu0 %v3125_v58, %s2627_s30 }
  0xcd   : > { %v3131_v11 = vpop.permute.xlu1 %657  ;;  %v3133_v56 = vpop.permute.xlu0 %655 }
  0xce   : > { %4341 = vst [vmem:[#allocation39_spill] sm:$0xff] %v3131_v11  ;;  %4342 = vst [vmem:[#allocation40_spill] sm:$0xff] %v3133_v56 }
  0xcf   : > { %901 = vrot.lane.b32.xlu1 %v3135_v35, %s2627_s30  ;;  %899 = vrot.lane.b32.xlu0 %v3137_v29, %s2627_s30 }
  0xd1   : > { %v3143_v7 = vpop.permute.xlu1 %661  ;;  %v3145_v23 = vpop.permute.xlu0 %659 }
  0xd2   : > { %4343 = vst [vmem:[#allocation41_spill] sm:$0xff] %v3143_v7  ;;  %4344 = vst [vmem:[#allocation42_spill] sm:$0xff] %v3145_v23 }
  0xd3   : > { %905 = vrot.lane.b32.xlu1 %v3147_v37, %s2627_s30  ;;  %903 = vrot.lane.b32.xlu0 %v3149_v59, %s2627_s30 }
  0xd5   : > { %v3155_v56 = vpop.permute.xlu1 %665  ;;  %v3157_v11 = vpop.permute.xlu0 %663 }
  0xd6   : > { %4345 = vst [vmem:[#allocation43_spill] sm:$0xff] %v3155_v56  ;;  %4346 = vst [vmem:[#allocation44_spill] sm:$0xff] %v3157_v11 }
  0xd7   : > { %909 = vrot.lane.b32.xlu1 %v3159_v36, %s2627_s30  ;;  %907 = vrot.lane.b32.xlu0 %v3161_v20, %s2627_s30  ;;  %v3183_v36 = vld [vmem:[#allocation2 + $0x170] sm:$0xff]  ;;  %v3185_v20 = vld [vmem:[#allocation2 + $0x168] sm:$0xff] }
  0xd8   : > { %4355 = vst [vmem:[#allocation53_spill] sm:$0xff] %v3183_v36  ;;  %4356 = vst [vmem:[#allocation54_spill] sm:$0xff] %v3185_v20 }
  0xd9   : > { %v3167_v23 = vpop.permute.xlu1 %669  ;;  %v3169_v7 = vpop.permute.xlu0 %667 }
  0xda   : > { %4349 = vst [vmem:[#allocation47_spill] sm:$0xff] %v3167_v23  ;;  %4350 = vst [vmem:[#allocation48_spill] sm:$0xff] %v3169_v7  ;;  %v3191_v7 = vld [vmem:[#allocation2 + $0x188] sm:$0xff]  ;;  %v3193_v23 = vld [vmem:[#allocation2 + $0x180] sm:$0xff] }
  0xdb   : > { %913 = vrot.lane.b32.xlu1 %v3171_v9, %s2627_s30  ;;  %911 = vrot.lane.b32.xlu0 %v3173_v27, %s2627_s30  ;;  %4357 = vst [vmem:[#allocation55_spill] sm:$0xff] %v3191_v7  ;;  %4358 = vst [vmem:[#allocation56_spill] sm:$0xff] %v3193_v23 }
  0xdd   : > { %v3179_v11 = vpop.permute.xlu1 %737  ;;  %v3181_v56 = vpop.permute.xlu0 %735 }
  0xde   : > { %4353 = vst [vmem:[#allocation51_spill] sm:$0xff] %v3179_v11  ;;  %4354 = vst [vmem:[#allocation52_spill] sm:$0xff] %v3181_v56  ;;  %v3203_v11 = vld [vmem:[#allocation2 + $0x1a0] sm:$0xff]  ;;  %v3205_v56 = vld [vmem:[#allocation2 + $0x198] sm:$0xff] }
  0xdf   : > { %917 = vrot.lane.b32.xlu1 %v3183_v36, %s2627_s30  ;;  %915 = vrot.lane.b32.xlu0 %v3185_v20, %s2627_s30  ;;  %v1604_v20 = vsel %vm173_vm0, %v3027_v1, %v3017_v61  ;;  %v1606_v61 = vsel %vm173_vm0, %v3039_v13, %v3023_v63 }
  0xe1   : > { %v3195_v9 = vpop.permute.xlu1 %741  ;;  %v3197_v27 = vpop.permute.xlu0 %739 }
  0xe2   : > { %4359 = vst [vmem:[#allocation57_spill] sm:$0xff] %v3195_v9  ;;  %4360 = vst [vmem:[#allocation58_spill] sm:$0xff] %v3197_v27  ;;  %v1603_v9 = vsel %vm173_vm0, %v3029_v2, %v3019_v62  ;;  %v1605_v62 = vsel %vm173_vm0, %v3041_v15, %v3025_v0 }
  0xe3   : > { %921 = vrot.lane.b32.xlu1 %v3191_v7, %s2627_s30  ;;  %919 = vrot.lane.b32.xlu0 %v3193_v23, %s2627_s30 }
  0xe5   : > { %v746_v27 = vpop.permute.xlu1 %745  ;;  %v744_v36 = vpop.permute.xlu0 %743 }
  0xe6   : > { %v3214_v7 = vsel %vm1631_vm3, %v1604_v20, %v746_v27  ;;  %v3217_v23 = vsel %vm1631_vm3, %v1603_v9, %v744_v36 }
  0xe7   : > { %925 = vrot.lane.b32.xlu1 %v3203_v11, %s2627_s30  ;;  %923 = vrot.lane.b32.xlu0 %v3205_v56, %s2627_s30  ;;  %s2333_s30 = sshll.u32 %s161_s28, 8 }
  0xe9   : > { %v750_v1 = vpop.permute.xlu1 %749  ;;  %v748_v27 = vpop.permute.xlu0 %747 }
  0xea   : > { %v3230_v2 = vsel %vm1631_vm3, %v1606_v61, %v750_v1  ;;  %v3233_v9 = vsel %vm1631_vm3, %v1605_v62, %v748_v27  ;;  %v1864_v1 = vld [vmem:[%s4261_s1 + $0x10] sm:$0xff] }
  0xeb   : > { %993 = vrot.lane.b32.xlu1 %v2794_v24, %s2628_s3  ;;  %991 = vrot.lane.b32.xlu0 %v2796_v25, %s2628_s3 }
  0xed   : > { %v3239_v36 = vpop.permute.xlu1 %753  ;;  %v3241_v63 = vpop.permute.xlu0 %751 }
  0xef   : > { %997 = vrot.lane.b32.xlu1 %v2811_v30, %s2628_s3  ;;  %995 = vrot.lane.b32.xlu0 %v2813_v31, %s2628_s3 }
  0xf1   : > { %v3247_v0 = vpop.permute.xlu1 %757  ;;  %v3249_v13 = vpop.permute.xlu0 %755 }
  0xf3   : > { %1001 = vrot.lane.b32.xlu1 %v2820_v32, %s2628_s3  ;;  %999 = vrot.lane.b32.xlu0 %v2822_v33, %s2628_s3 }
  0xf5   : > { %v3255_v24 = vpop.permute.xlu1 %761  ;;  %v3257_v25 = vpop.permute.xlu0 %759 }
  0xf7   : > { %1005 = vrot.lane.b32.xlu1 %v2838_v39, %s2628_s3  ;;  %1003 = vrot.lane.b32.xlu0 %v2840_v40, %s2628_s3 }
  0xf9   : > { %v3263_v30 = vpop.permute.xlu1 %765  ;;  %v3265_v31 = vpop.permute.xlu0 %763 }
  0xfb   : > { %1009 = vrot.lane.b32.xlu1 %v2846_v41, %s2628_s3  ;;  %1007 = vrot.lane.b32.xlu0 %v2848_v42, %s2628_s3  ;;  %v1620_v41 = vsel %vm173_vm0, %v3123_v12, %v3107_v38  ;;  %v1619_v42 = vsel %vm173_vm0, %v3125_v58, %v3109_v14 }
  0xfd   : > { %v3271_v15 = vpop.permute.xlu1 %769  ;;  %v3273_v20 = vpop.permute.xlu0 %767 }
  0xff   : > { %1013 = vrot.lane.b32.xlu1 %v2854_v43, %s2628_s3  ;;  %1011 = vrot.lane.b32.xlu0 %v2856_v44, %s2628_s3 }
 0x101   : > { %v3279_v39 = vpop.permute.xlu1 %773  ;;  %v3281_v40 = vpop.permute.xlu0 %771 }
 0x103   : > { %1017 = vrot.lane.b32.xlu1 %v2862_v45, %s2628_s3  ;;  %1015 = vrot.lane.b32.xlu0 %v2864_v46, %s2628_s3  ;;  %v1622_v45 = vsel %vm173_vm0, %v3135_v35, %v3119_v34  ;;  %v1621_v46 = vsel %vm173_vm0, %v3137_v29, %v3121_v57  ;;  %v1865_v35 = vld [vmem:[%s4261_s1 + $0x18] sm:$0xff] }
 0x105   : > { %v778_v43 = vpop.permute.xlu1 %777  ;;  %v776_v44 = vpop.permute.xlu0 %775 }
 0x106   : > { %v3294_v61 = vsel %vm1631_vm3, %v1620_v41, %v778_v43  ;;  %v3297_v62 = vsel %vm1631_vm3, %v1619_v42, %v776_v44  ;;  %v1863_v42 = vld [vmem:[%s4261_s1 + $0x8] sm:$0xff]  ;;  %v1862_v44 = vld [vmem:[%s4261_s1] sm:$0xff] }
 0x107   : > { %1021 = vrot.lane.b32.xlu1 %v2870_v47, %s2628_s3  ;;  %1019 = vrot.lane.b32.xlu0 %v2872_v48, %s2628_s3 }
 0x109   : > { %v782_v58 = vpop.permute.xlu1 %781  ;;  %v780_v12 = vpop.permute.xlu0 %779 }
 0x10a   : > { %v3310_v14 = vsel %vm1631_vm3, %v1622_v45, %v782_v58  ;;  %v3313_v38 = vsel %vm1631_vm3, %v1621_v46, %v780_v12  ;;  %v1607_v58 = vsel %vm173_vm0, %v3053_v19, %v3037_v4  ;;  %v1609_v4 = vsel %vm173_vm0, %v3065_v55, %v3049_v17  ;;  %v4365_v17 = vld [vmem:[#allocation23_spill] sm:$0xff] }
 0x10b   : > { %1025 = vrot.lane.b32.xlu1 %v2878_v49, %s2628_s3  ;;  %1023 = vrot.lane.b32.xlu0 %v2880_v50, %s2628_s3 }
 0x10d   : > { %v3319_v47 = vpop.permute.xlu1 %785  ;;  %v3321_v48 = vpop.permute.xlu0 %783 }
 0x10f   : > { %1151 = vrot.lane.b32.xlu1 %v2971_v22, %s2629_s4  ;;  %1119 = vrot.lane.b32.xlu0 %v2928_v6, %s2629_s4 }
 0x111   : > { %v3327_v57 = vpop.permute.xlu1 %789  ;;  %v3329_v29 = vpop.permute.xlu0 %787 }
 0x113   : > { %1153 = vrot.lane.b32.xlu1 %v2969_v21, %s2629_s4  ;;  %1121 = vrot.lane.b32.xlu0 %v2926_v5, %s2629_s4  ;;  %v1866_v5 = vld [vmem:[%s4261_s1 + $0x20] sm:$0xf] }
 0x114   : > { %2413 = vmatprep.subr.msk.mxu0 %vm1964_vm4, %v1866_v5  ;;  %2471 = vmatprep.subr.msk.mxu1 %vm1964_vm4, %v1866_v5 }
 0x115   : > { %v3335_v49 = vpop.permute.xlu1 %793  ;;  %v3337_v50 = vpop.permute.xlu0 %791  ;;  %2414 = vmatpush3.msk.msra.mxu0 %vm1964_vm4, %v1866_v5  ;;  %2476 = vmatpush3.msk.msra.mxu1 %vm1964_vm4, %v1866_v5 }
 0x116   : > { %2415 = vmatprep.subr.mxu0 %v1865_v35  ;;  %2472 = vmatprep.subr.mxu1 %v1865_v35 }
 0x117   : > { %1279 = vrot.lane.b32.xlu1 %v3149_v59, %s2630_s5  ;;  %1247 = vrot.lane.b32.xlu0 %v3053_v19, %s2630_s5  ;;  %v1642_v19 = vsel %vm1631_vm3, %v1609_v4, %v3249_v13  ;;  %v4368_v13 = vld [vmem:[#allocation28_spill] sm:$0xff]  ;;  %v4375_v4 = vld [vmem:[#allocation26_spill] sm:$0xff] }
 0x118   : > { %2416 = vmatpush3.msra.mxu0 %v1865_v35  ;;  %2477 = vmatpush3.msra.mxu1 %v1865_v35 }
 0x119   : > { %v3343_v6 = vpop.permute.xlu1 %797  ;;  %v3345_v22 = vpop.permute.xlu0 %795  ;;  %2417 = vmatprep.subr.mxu0 %v1864_v1  ;;  %2473 = vmatprep.subr.mxu1 %v1864_v1 }
 0x11a   : > { %2418 = vmatpush3.msra.mxu0 %v1864_v1  ;;  %2478 = vmatpush3.msra.mxu1 %v1864_v1  ;;  %v4364_v1 = vld [vmem:[#allocation9_spill] sm:$0xff] }
 0x11b   : > { %1281 = vrot.lane.b32.xlu1 %v3147_v37, %s2630_s5  ;;  %1249 = vrot.lane.b32.xlu0 %v3051_v18, %s2630_s5 }
 0x11c   : > { %2419 = vmatprep.subr.mxu0 %v1863_v42  ;;  %2474 = vmatprep.subr.mxu1 %v1863_v42 }
 0x11d   : > { %v3354_v21 = vpop.permute.xlu1 %865  ;;  %v3356_v34 = vpop.permute.xlu0 %863  ;;  %2420 = vmatpush3.msra.mxu0 %v1863_v42  ;;  %2479 = vmatpush3.msra.mxu1 %v1863_v42  ;;  %v4366_v42 = vld [vmem:[#allocation27_spill] sm:$0xff] }
 0x11e   : > { %2421 = vmatprep.subr.mxu0 %v1862_v44  ;;  %2475 = vmatprep.subr.mxu1 %v1862_v44 }
 0x11f   : > { %1407 = vrot.lane.b32.xlu1 %v2896_v54, %s2631_s16  ;;  %1375 = vrot.lane.b32.xlu0 %v2822_v33, %s2631_s16 }
 0x120   : > { %2422 = vmatpush3.msra.mxu0 %v1862_v44  ;;  %2480 = vmatpush3.msra.mxu1 %v1862_v44 }
 0x121   : > { %v3368_v27 = vpop.permute.xlu1 %869  ;;  %v3370_v41 = vpop.permute.xlu0 %867 }
 0x123   : > { %1377 = vrot.lane.b32.xlu1 %v2820_v32, %s2631_s16  ;;  %1027 = vrot.lane.b32.xlu0 %v2888_v52, %s2628_s3 }
 0x125   : > { %v874_v33 = vpop.permute.xlu1 %873  ;;  %v872_v43 = vpop.permute.xlu0 %871 }
 0x126   : > { %v3384_v45 = vsel %vm1664_vm5, %v3214_v7, %v874_v33  ;;  %v3388_v32 = vsel %vm1664_vm5, %v3217_v23, %v872_v43  ;;  %v4367_v33 = vld [vmem:[#allocation24_spill] sm:$0xff] }
 0x127   : > { %1503 = vrot.lane.b32.xlu1 %v2944_v10, %s2632_s27  ;;  %1409 = vrot.lane.b32.xlu0 %v2894_v53, %s2631_s16  ;;  %v1608_v53 = vsel %vm173_vm0, %v3051_v18, %v3035_v3  ;;  %v1610_v3 = vsel %vm173_vm0, %v3063_v60, %v3047_v16  ;;  %v4363_v16 = vld [vmem:[#allocation14_spill] sm:$0xff]  ;;  %v1611_v43 = vsel %vm173_vm0, %v4368_v13, %v4367_v33 }
 0x128   : > { %v1643_v18 = vsel %vm1631_vm3, %v1610_v3, %v3247_v0  ;;  %v1612_v0 = vsel %vm173_vm0, %v4366_v42, %v4365_v17  ;;  %v4374_v3 = vld [vmem:[#allocation31_spill] sm:$0xff] }
 0x129   : > { %v878_v52 = vpop.permute.xlu1 %877  ;;  %v876_v46 = vpop.permute.xlu0 %875  ;;  %v1645_v44 = vsel %vm1631_vm3, %v1612_v0, %v3255_v24 }
 0x12a   : > { %v3396_v7 = vsel %vm1664_vm5, %v3230_v2, %v878_v52  ;;  %v3400_v23 = vsel %vm1664_vm5, %v3233_v9, %v876_v46  ;;  %v1641_v2 = vsel %vm1631_vm3, %v1608_v53, %v3239_v36  ;;  %v1640_v9 = vsel %vm1631_vm3, %v1607_v58, %v3241_v63 }
 0x12b   : > { %1029 = vrot.lane.b32.xlu1 %v2886_v51, %s2628_s3  ;;  %1535 = vrot.lane.b32.xlu0 %v2987_v28, %s2632_s27  ;;  %v1644_v52 = vsel %vm1631_vm3, %v1611_v43, %v3257_v25  ;;  %v4376_v25 = vld [vmem:[#allocation32_spill] sm:$0xff]  ;;  %v4379_v43 = vld [vmem:[#allocation46_spill] sm:$0xff] }
 0x12d   : > { %v882_v12 = vpop.permute.xlu1 %881  ;;  %v880_v5 = vpop.permute.xlu0 %879 }
 0x12e   : > { %v3417_v51 = vsel %vm1664_vm5, %v1641_v2, %v882_v12  ;;  %v3420_v35 = vsel %vm1664_vm5, %v1640_v9, %v880_v5  ;;  %v4371_v9 = vld [vmem:[#allocation13_spill] sm:$0xff]  ;;  %v4372_v12 = vld [vmem:[#allocation8_spill] sm:$0xff] }
 0x12f   : > { %1155 = vrot.lane.b32.xlu1 %v2979_v26, %s2629_s4  ;;  %1123 = vrot.lane.b32.xlu0 %v2936_v8, %s2629_s4  ;;  %v4373_v5 = vld [vmem:[#allocation25_spill] sm:$0xff] }
 0x130   : > { %v1614_v24 = vsel %vm173_vm0, %v4374_v3, %v4373_v5 }
 0x131   : > { %v886_v36 = vpop.permute.xlu1 %885  ;;  %v884_v63 = vpop.permute.xlu0 %883 }
 0x132   : > { %v3437_v26 = vsel %vm1664_vm5, %v1643_v18, %v886_v36  ;;  %v3440_v8 = vsel %vm1664_vm5, %v1642_v19, %v884_v63  ;;  %v1613_v18 = vsel %vm173_vm0, %v4376_v25, %v4375_v4  ;;  %v1647_v19 = vsel %vm1631_vm3, %v1614_v24, %v3263_v30 }
 0x133   : > { %4361 = vst [vmem:[#allocation59_spill] sm:$0xff] %v3437_v26  ;;  %4362 = vst [vmem:[#allocation60_spill] sm:$0xff] %v3440_v8  ;;  %1537 = vrot.lane.b32.xlu1 %v4363_v16, %s2632_s27  ;;  %1505 = vrot.lane.b32.xlu0 %v4364_v1, %s2632_s27  ;;  %v1646_v36 = vsel %vm1631_vm3, %v1613_v18, %v3265_v31  ;;  %v4380_v31 = vld [vmem:[#allocation45_spill] sm:$0xff]  ;;  %v4418_v8 = vld [vmem:[#allocation36_spill] sm:$0xff] }
 0x135   : > { %v890_v46 = vpop.permute.xlu1 %889  ;;  %v888_v53 = vpop.permute.xlu0 %887 }
 0x136   : > { %v3457_v58 = vsel %vm1664_vm5, %v1645_v44, %v890_v46  ;;  %v3460_v2 = vsel %vm1664_vm5, %v1644_v52, %v888_v53  ;;  %v513_v52 = vld [vmem:[#allocation2 + $0x7a] sm:$0xff] }
 0x137   : > { %4369 = vst [vmem:[#allocation14_spill] sm:$0xff] %v3457_v58  ;;  %4370 = vst [vmem:[#allocation9_spill] sm:$0xff] %v3460_v2  ;;  %1157 = vrot.lane.b32.xlu1 %v4371_v9, %s2629_s4  ;;  %1125 = vrot.lane.b32.xlu0 %v4372_v12, %s2629_s4  ;;  %v4381_v9 = vld [vmem:[#allocation7_spill] sm:$0xff] }
 0x139   : > { %v894_v63 = vpop.permute.xlu1 %893  ;;  %v892_v17 = vpop.permute.xlu0 %891 }
 0x13a   : > { %v3477_v0 = vsel %vm1664_vm5, %v1647_v19, %v894_v63  ;;  %v3480_v33 = vsel %vm1664_vm5, %v1646_v36, %v892_v17  ;;  %v4384_v63 = vld [vmem:[#allocation39_spill] sm:$0xff]  ;;  %v4385_v17 = vld [vmem:[#allocation40_spill] sm:$0xff] }
 0x13b   : > { %4377 = vst [vmem:[#allocation23_spill] sm:$0xff] %v3477_v0  ;;  %4378 = vst [vmem:[#allocation27_spill] sm:$0xff] %v3480_v33  ;;  %1283 = vrot.lane.b32.xlu1 %v4379_v43, %s2630_s5  ;;  %1251 = vrot.lane.b32.xlu0 %v3065_v55, %s2630_s5  ;;  %v514_v55 = vld [vmem:[#allocation2 + $0x82] sm:$0xff] }
 0x13d   : > { %v3486_v44 = vpop.permute.xlu1 %897  ;;  %v3488_v30 = vpop.permute.xlu0 %895 }
 0x13f   : > { %1285 = vrot.lane.b32.xlu1 %v4380_v31, %s2630_s5  ;;  %1253 = vrot.lane.b32.xlu0 %v3063_v60, %s2630_s5 }
 0x141   : > { %v3494_v46 = vpop.permute.xlu1 %901  ;;  %v3496_v53 = vpop.permute.xlu0 %899 }
 0x143   : > { %1411 = vrot.lane.b32.xlu1 %v4381_v9, %s2631_s16  ;;  %1379 = vrot.lane.b32.xlu0 %v513_v52, %s2631_s16  ;;  %v1623_v52 = vsel %vm173_vm0, %v3149_v59, %v4385_v17  ;;  %v4388_v59 = vld [vmem:[#allocation41_spill] sm:$0xff] }
 0x145   : > { %v906_v12 = vpop.permute.xlu1 %905  ;;  %v904_v5 = vpop.permute.xlu0 %903 }
 0x146   : > { %v3503_v24 = vsel %vm1664_vm5, %v3294_v61, %v906_v12  ;;  %v3507_v60 = vsel %vm1664_vm5, %v3297_v62, %v904_v5  ;;  %v4382_v61 = vld [vmem:[#allocation11_spill] sm:$0xff]  ;;  %v4383_v62 = vld [vmem:[#allocation6_spill] sm:$0xff] }
 0x147   : > { %1381 = vrot.lane.b32.xlu1 %v514_v55, %s2631_s16  ;;  %1031 = vrot.lane.b32.xlu0 %v2896_v54, %s2628_s3  ;;  %v1624_v54 = vsel %vm173_vm0, %v3147_v37, %v4384_v63  ;;  %v4387_v37 = vld [vmem:[#allocation16_spill] sm:$0xff] }
 0x148   : > { %v1657_v9 = vsel %vm1631_vm3, %v1624_v54, %v3319_v47  ;;  %v1626_v47 = vsel %vm173_vm0, %v4380_v31, %v4388_v59  ;;  %v4393_v31 = vld [vmem:[#allocation49_spill] sm:$0xff] }
 0x149   : > { %v910_v4 = vpop.permute.xlu1 %909  ;;  %v908_v18 = vpop.permute.xlu0 %907 }
 0x14a   : > { %v3514_v19 = vsel %vm1664_vm5, %v3310_v14, %v910_v4  ;;  %v3518_v36 = vsel %vm1664_vm5, %v3313_v38, %v908_v18  ;;  %v435_v14 = vld [vmem:[#allocation2 + $0x12a] sm:$0xff]  ;;  %v1656_v38 = vsel %vm1631_vm3, %v1623_v52, %v3321_v48  ;;  %v4389_v18 = vld [vmem:[#allocation42_spill] sm:$0xff] }
 0x14b   : > { %1507 = vrot.lane.b32.xlu1 %v4382_v61, %s2632_s27  ;;  %1413 = vrot.lane.b32.xlu0 %v4383_v62, %s2631_s16  ;;  %v1625_v48 = vsel %vm173_vm0, %v4379_v43, %v4389_v18  ;;  %v1659_v61 = vsel %vm1631_vm3, %v1626_v47, %v3327_v57  ;;  %v4392_v43 = vld [vmem:[#allocation43_spill] sm:$0xff]  ;;  %v4399_v18 = vld [vmem:[#allocation10_spill] sm:$0xff] }
 0x14c   : > { %v1658_v62 = vsel %vm1631_vm3, %v1625_v48, %v3329_v29  ;;  %v1628_v57 = vsel %vm173_vm0, %v4393_v31, %v4392_v43  ;;  %v4395_v29 = vld [vmem:[#allocation50_spill] sm:$0xff]  ;;  %v4398_v47 = vld [vmem:[#allocation15_spill] sm:$0xff] }
 0x14d   : > { %v914_v55 = vpop.permute.xlu1 %913  ;;  %v912_v12 = vpop.permute.xlu0 %911  ;;  %v4400_v48 = vld [vmem:[#allocation47_spill] sm:$0xff] }
 0x14e   : > { %v3535_v5 = vsel %vm1664_vm5, %v1657_v9, %v914_v55  ;;  %v3538_v4 = vsel %vm1664_vm5, %v1656_v38, %v912_v12  ;;  %v1661_v38 = vsel %vm1631_vm3, %v1628_v57, %v3335_v49 }
 0x14f   : > { %4386 = vst [vmem:[#allocation24_spill] sm:$0xff] %v3535_v5  ;;  %1033 = vrot.lane.b32.xlu1 %v435_v14, %s2628_s3  ;;  %1539 = vrot.lane.b32.xlu0 %v4387_v37, %s2632_s27  ;;  %v4394_v14 = vld [vmem:[#allocation44_spill] sm:$0xff] }
 0x150   : > { %v1627_v9 = vsel %vm173_vm0, %v4395_v29, %v4394_v14 }
 0x151   : > { %v918_v63 = vpop.permute.xlu1 %917  ;;  %v916_v54 = vpop.permute.xlu0 %915  ;;  %v1660_v55 = vsel %vm1631_vm3, %v1627_v9, %v3337_v50  ;;  %v4403_v50 = vld [vmem:[#allocation54_spill] sm:$0xff] }
 0x152   : > { %v3554_v17 = vsel %vm1664_vm5, %v1659_v61, %v918_v63  ;;  %v3557_v52 = vsel %vm1664_vm5, %v1658_v62, %v916_v54  ;;  %v4401_v61 = vld [vmem:[#allocation53_spill] sm:$0xff]  ;;  %v4402_v62 = vld [vmem:[#allocation48_spill] sm:$0xff] }
 0x153   : > { %4390 = vst [vmem:[#allocation28_spill] sm:$0xff] %v3554_v17  ;;  %4391 = vst [vmem:[#allocation13_spill] sm:$0xff] %v3557_v52  ;;  %1159 = vrot.lane.b32.xlu1 %v2987_v28, %s2629_s4  ;;  %1127 = vrot.lane.b32.xlu0 %v2944_v10, %s2629_s4  ;;  %v1630_v49 = vsel %vm173_vm0, %v4401_v61, %v4400_v48  ;;  %v1629_v63 = vsel %vm173_vm0, %v4403_v50, %v4402_v62 }
 0x154   : > { %v1663_v54 = vsel %vm1631_vm3, %v1630_v49, %v3343_v6  ;;  %v1662_v43 = vsel %vm1631_vm3, %v1629_v63, %v3345_v22  ;;  %v4406_v63 = vld [vmem:[#allocation12_spill] sm:$0xff] }
 0x155   : > { %v922_v12 = vpop.permute.xlu1 %921  ;;  %v920_v59 = vpop.permute.xlu0 %919 }
 0x156   : > { %v3574_v28 = vsel %vm1664_vm5, %v1661_v38, %v922_v12  ;;  %v3577_v10 = vsel %vm1664_vm5, %v1660_v55, %v920_v59 }
 0x157   : > { %4396 = vst [vmem:[#allocation8_spill] sm:$0xff] %v3574_v28  ;;  %4397 = vst [vmem:[#allocation25_spill] sm:$0xff] %v3577_v10  ;;  %1541 = vrot.lane.b32.xlu1 %v4398_v47, %s2632_s27  ;;  %1509 = vrot.lane.b32.xlu0 %v4399_v18, %s2632_s27 }
 0x159   : > { %v926_v57 = vpop.permute.xlu1 %925  ;;  %v924_v14 = vpop.permute.xlu0 %923 }
 0x15a   : > { %v3594_v9 = vsel %vm1664_vm5, %v1663_v54, %v926_v57  ;;  %v3597_v38 = vsel %vm1664_vm5, %v1662_v43, %v924_v14  ;;  %v437_v54 = vld [vmem:[#allocation2 + $0x142] sm:$0xff]  ;;  %v4409_v14 = vld [vmem:[#allocation20_spill] sm:$0xff] }
 0x15b   : > { %4404 = vst [vmem:[#allocation31_spill] sm:$0xff] %v3594_v9  ;;  %4405 = vst [vmem:[#allocation26_spill] sm:$0xff] %v3597_v38  ;;  %1161 = vrot.lane.b32.xlu1 %v4363_v16, %s2629_s4  ;;  %1129 = vrot.lane.b32.xlu0 %v4364_v1, %s2629_s4  ;;  %v531_v16 = vld [vmem:[#allocation2 + $0x152] sm:$0xff] }
 0x15c   : > { %v515_v1 = vld [vmem:[#allocation2 + $0x92] sm:$0xff] }
 0x15d   : > { %v3603_v55 = vpop.permute.xlu1 %993  ;;  %v3605_v6 = vpop.permute.xlu0 %991 }
 0x15f   : > { %1287 = vrot.lane.b32.xlu1 %v4395_v29, %s2630_s5  ;;  %1255 = vrot.lane.b32.xlu0 %v4368_v13, %s2630_s5  ;;  %v516_v13 = vld [vmem:[#allocation2 + $0x9a] sm:$0xff] }
 0x160   : > { %v436_v29 = vld [vmem:[#allocation2 + $0x13a] sm:$0xff] }
 0x161   : > { %v3611_v22 = vpop.permute.xlu1 %997  ;;  %v3613_v12 = vpop.permute.xlu0 %995 }
 0x163   : > { %1289 = vrot.lane.b32.xlu1 %v4393_v31, %s2630_s5  ;;  %1257 = vrot.lane.b32.xlu0 %v4366_v42, %s2630_s5  ;;  %v3631_v42 = vld [vmem:[#allocation2 + $0x15a] sm:$0xff] }
 0x165   : > { %v3619_v59 = vpop.permute.xlu1 %1001  ;;  %v3621_v18 = vpop.permute.xlu0 %999 }
 0x167   : > { %1415 = vrot.lane.b32.xlu1 %v531_v16, %s2631_s16  ;;  %1383 = vrot.lane.b32.xlu0 %v515_v1, %s2631_s16  ;;  %v452_v1 = vld [vmem:[#allocation2 + $0x7c] sm:$0xff] }
 0x169   : > { %v3625_v48 = vpop.permute.xlu1 %1005  ;;  %v3627_v49 = vpop.permute.xlu0 %1003 }
 0x16b   : > { %1385 = vrot.lane.b32.xlu1 %v516_v13, %s2631_s16  ;;  %1035 = vrot.lane.b32.xlu0 %v436_v29, %s2628_s3 }
 0x16d   : > { %v3633_v31 = vpop.permute.xlu1 %1009  ;;  %v3635_v62 = vpop.permute.xlu0 %1007 }
 0x16f   : > { %1511 = vrot.lane.b32.xlu1 %v4406_v63, %s2632_s27  ;;  %1417 = vrot.lane.b32.xlu0 %v3631_v42, %s2631_s16  ;;  %v3655_v63 = vld [vmem:[#allocation2 + $0x9c] sm:$0xff] }
 0x171   : > { %v3641_v43 = vpop.permute.xlu1 %1013  ;;  %v3643_v57 = vpop.permute.xlu0 %1011 }
 0x172   : > { %4407 = vst [vmem:[#allocation32_spill] sm:$0xff] %v3641_v43  ;;  %4408 = vst [vmem:[#allocation46_spill] sm:$0xff] %v3643_v57 }
 0x173   : > { %1037 = vrot.lane.b32.xlu1 %v437_v54, %s2628_s3  ;;  %1543 = vrot.lane.b32.xlu0 %v4409_v14, %s2632_s27  ;;  %v4414_v54 = vld [vmem:[#allocation19_spill] sm:$0xff] }
 0x174   : > { %v453_v14 = vld [vmem:[#allocation2 + $0x84] sm:$0xff] }
 0x175   : > { %v3648_v13 = vpop.permute.xlu1 %1017  ;;  %v3650_v29 = vpop.permute.xlu0 %1015 }
 0x176   : > { %4410 = vst [vmem:[#allocation45_spill] sm:$0xff] %v3648_v13  ;;  %4411 = vst [vmem:[#allocation7_spill] sm:$0xff] %v3650_v29  ;;  %v3695_v13 = vld [vmem:[#allocation2 + $0x172] sm:$0xff]  ;;  %v4415_v29 = vld [vmem:[#allocation18_spill] sm:$0xff] }
 0x177   : > { %1163 = vrot.lane.b32.xlu1 %v4387_v37, %s2629_s4  ;;  %1131 = vrot.lane.b32.xlu0 %v452_v1, %s2629_s4 }
 0x179   : > { %v3657_v9 = vpop.permute.xlu1 %1021  ;;  %v3659_v0 = vpop.permute.xlu0 %1019 }
 0x17a   : > { %4412 = vst [vmem:[#allocation11_spill] sm:$0xff] %v3657_v9  ;;  %4413 = vst [vmem:[#allocation6_spill] sm:$0xff] %v3659_v0 }
 0x17b   : > { %1545 = vrot.lane.b32.xlu1 %v4414_v54, %s2632_s27  ;;  %1513 = vrot.lane.b32.xlu0 %v3655_v63, %s2632_s27 }
 0x17d   : > { %v3665_v38 = vpop.permute.xlu1 %1025  ;;  %v1024_v33 = vpop.permute.xlu0 %1023 }
 0x17f   : > { %1165 = vrot.lane.b32.xlu1 %v4398_v47, %s2629_s4  ;;  %1133 = vrot.lane.b32.xlu0 %v453_v14, %s2629_s4  ;;  %v3682_v47 = vld [vmem:[#allocation2 + $0x16a] sm:$0xff] }
 0x180   : > { %v517_v14 = vld [vmem:[#allocation2 + $0xaa] sm:$0xff] }
 0x181   : > { %v1152_v37 = vpop.permute.xlu1 %1151  ;;  %v1120_v1 = vpop.permute.xlu0 %1119 }
 0x183   : > { %1291 = vrot.lane.b32.xlu1 %v4403_v50, %s2630_s5  ;;  %1259 = vrot.lane.b32.xlu0 %v4376_v25, %s2630_s5  ;;  %v518_v25 = vld [vmem:[#allocation2 + $0xb2] sm:$0xff] }
 0x185   : > { %v3674_v54 = vpop.permute.xlu1 %1153  ;;  %v3676_v9 = vpop.permute.xlu0 %1121 }
 0x187   : > { %1293 = vrot.lane.b32.xlu1 %v4401_v61, %s2630_s5  ;;  %1261 = vrot.lane.b32.xlu0 %v4374_v3, %s2630_s5  ;;  %v286_v3 = vld [vmem:[#allocation2] sm:$0xff]  ;;  %v3693_v61 = vld [vmem:[#allocation2 + $0xac] sm:$0xff] }
 0x188   : > { %v1599_v17 = vsel %vm173_vm0, %v286_v3, %v4415_v29  ;;  %v4417_v3 = vld [vmem:[#allocation30_spill] sm:$0xff] }
 0x189   : > { %v1280_v0 = vpop.permute.xlu1 %1279  ;;  %v1248_v28 = vpop.permute.xlu0 %1247  ;;  %v1615_v57 = vsel %vm173_vm0, %v4418_v8, %v4417_v3 }
 0x18b   : > { %1419 = vrot.lane.b32.xlu1 %v3682_v47, %s2631_s16  ;;  %1387 = vrot.lane.b32.xlu0 %v517_v14, %s2631_s16  ;;  %v4416_v14 = vld [vmem:[#allocation52_spill] sm:$0xff] }
 0x18d   : > { %v3687_v50 = vpop.permute.xlu1 %1281  ;;  %v3689_v58 = vpop.permute.xlu0 %1249 }
 0x18f   : > { %1389 = vrot.lane.b32.xlu1 %v518_v25, %s2631_s16  ;;  %1039 = vrot.lane.b32.xlu0 %v531_v16, %s2628_s3  ;;  %v1632_v16 = vsel %vm1631_vm3, %v1599_v17, %v4416_v14  ;;  %v3705_v25 = vld [vmem:[#allocation2 + $0x16c] sm:$0xff] }
 0x190   : > { %v1665_v26 = vsel %vm1664_vm5, %v1632_v16, %v3356_v34  ;;  %v1648_v34 = vsel %vm1631_vm3, %v1615_v57, %v3273_v20  ;;  %v287_v20 = vld [vmem:[#allocation2 + $0x8] sm:$0xff] }
 0x191   : > { %v1408_v10 = vpop.permute.xlu1 %1407  ;;  %v1376_v2 = vpop.permute.xlu0 %1375  ;;  %v1698_v29 = vsel %vm1697_vm6, %v1665_v26, %v3605_v6  ;;  %v470_v26 = vld [vmem:[#allocation2 + $0x154] sm:$0xff]  ;;  %v1681_v16 = vsel %vm1664_vm5, %v1648_v34, %v3488_v30  ;;  %v4419_v34 = vld [vmem:[#allocation22_spill] sm:$0xff] }
 0x192   : > { %v1731_v17 = vsel %vm1730_vm7, %v1698_v29, %v1120_v1  ;;  %v454_v6 = vld [vmem:[#allocation2 + $0x94] sm:$0xff] }
 0x193   : > { %1515 = vrot.lane.b32.xlu1 %v3693_v61, %s2632_s27  ;;  %1421 = vrot.lane.b32.xlu0 %v3695_v13, %s2631_s16  ;;  %v1764_v14 = vsel %vm1763_vm8, %v1731_v17, %v1248_v28  ;;  %v3734_v30 = vld [vmem:[#allocation2 + $0x174] sm:$0xff] }
 0x194   : > { %v1797_v8 = vsel %vm1796_vm9, %v1764_v14, %v1376_v2  ;;  %v3736_v2 = vld [vmem:[#allocation2 + $0xb4] sm:$0xff]  ;;  %v1600_v14 = vsel %vm173_vm0, %v287_v20, %v4419_v34 }
 0x195   : > { %v1378_v43 = vpop.permute.xlu1 %1377  ;;  %v3709_v52 = vpop.permute.xlu0 %1027 }
 0x197   : > { %1041 = vrot.lane.b32.xlu1 %v3631_v42, %s2628_s3  ;;  %1547 = vrot.lane.b32.xlu0 %v3705_v25, %s2632_s27  ;;  %v1714_v42 = vsel %vm1697_vm6, %v1681_v16, %v1024_v33 }
 0x198   : > { %v1747_v5 = vsel %vm1730_vm7, %v1714_v42, %v1152_v37 }
 0x199   : > { %v1504_v1 = vpop.permute.xlu1 %1503  ;;  %v1410_v29 = vpop.permute.xlu0 %1409  ;;  %v1780_v28 = vsel %vm1763_vm8, %v1747_v5, %v1280_v0  ;;  %v4422_v5 = vld [vmem:[#allocation51_spill] sm:$0xff] }
 0x19a   : > { %v1830_v3 = vsel %vm1829_vm10, %v1797_v8, %v1504_v1  ;;  %v1813_v57 = vsel %vm1796_vm9, %v1780_v28, %v1408_v10  ;;  %v1633_v10 = vsel %vm1631_vm3, %v1600_v14, %v4422_v5  ;;  %v471_v8 = vld [vmem:[#allocation2 + $0x15c] sm:$0xff] }
 0x19b   : > { %1167 = vrot.lane.b32.xlu1 %v470_v26, %s2629_s4  ;;  %1135 = vrot.lane.b32.xlu0 %v454_v6, %s2629_s4  ;;  %v4420_v26 = vld [vmem:[#allocation29_spill] sm:$0xff]  ;;  %v4421_v6 = vld [vmem:[#allocation35_spill] sm:$0xff]  ;;  %v1666_v1 = vsel %vm1664_vm5, %v1633_v10, %v3354_v21 }
 0x19c   : > { %2423 = vmatprep.mubr.msk.f32.mxu0 %vm1867_vm11, %v1830_v3  ;;  %v1616_v0 = vsel %vm173_vm0, %v4421_v6, %v4420_v26  ;;  %v1699_v28 = vsel %vm1697_vm6, %v1666_v1, %v3603_v55  ;;  %v487_v55 = vld [vmem:[#allocation2 + $0xc0] sm:$0xff]  ;;  %v4423_v26 = vld [vmem:[#allocation56_spill] sm:$0xff]  ;;  %v288_v1 = vld [vmem:[#allocation2 + $0x18] sm:$0xff] }
 0x19d   : > { %v3739_v33 = vpop.permute.xlu1 %1029  ;;  %v1536_v17 = vpop.permute.xlu0 %1535  ;;  %v1649_v16 = vsel %vm1631_vm3, %v1616_v0, %v3271_v15  ;;  %v519_v6 = vld [vmem:[#allocation2 + $0xc2] sm:$0xff]  ;;  %v520_v10 = vld [vmem:[#allocation2 + $0xca] sm:$0xff] }
 0x19e   : > { %v1846_v37 = vsel %vm1829_vm10, %v1813_v57, %v1536_v17  ;;  %v1682_v42 = vsel %vm1664_vm5, %v1649_v16, %v3486_v44  ;;  %v1732_v17 = vsel %vm1730_vm7, %v1699_v28, %v3676_v9  ;;  %v3803_v28 = vld [vmem:[#allocation2 + $0x18a] sm:$0xff] }
 0x19f   : > { %1549 = vrot.lane.b32.xlu1 %v3734_v30, %s2632_s27  ;;  %1517 = vrot.lane.b32.xlu0 %v3736_v2, %s2632_s27  ;;  %v1715_v57 = vsel %vm1697_vm6, %v1682_v42, %v3665_v38  ;;  %v1765_v44 = vsel %vm1763_vm8, %v1732_v17, %v3689_v58  ;;  %v488_v58 = vld [vmem:[#allocation2 + $0xc8] sm:$0xff]  ;;  %v4425_v17 = vld [vmem:[#allocation17_spill] sm:$0xff] }
 0x1a0   : > { %2447 = vmatprep.mubr.msk.f32.mxu1 %vm1867_vm11, %v1846_v37  ;;  %v1748_v15 = vsel %vm1730_vm7, %v1715_v57, %v3674_v54  ;;  %v1798_v38 = vsel %vm1796_vm9, %v1765_v44, %v1378_v43  ;;  %v3801_v42 = vld [vmem:[#allocation2 + $0xc4] sm:$0xff] }
 0x1a1   : > { %v3760_v3 = vpop.permute.xlu1 %1155  ;;  %v1124_v20 = vpop.permute.xlu0 %1123  ;;  %v1781_v21 = vsel %vm1763_vm8, %v1748_v15, %v3687_v50  ;;  %v4424_v50 = vld [vmem:[#allocation55_spill] sm:$0xff]  ;;  %v4426_v44 = vld [vmem:[#allocation58_spill] sm:$0xff] }
 0x1a2   : > { %v1814_v37 = vsel %vm1796_vm9, %v1781_v21, %v1410_v29  ;;  %v3793_v29 = vld [vmem:[#allocation2 + $0x182] sm:$0xff]  ;;  %v1601_v21 = vsel %vm173_vm0, %v288_v1, %v4425_v17 }
 0x1a3   : > { %1169 = vrot.lane.b32.xlu1 %v471_v8, %s2629_s4  ;;  %1137 = vrot.lane.b32.xlu0 %v3655_v63, %s2629_s4 }
 0x1a5   : > { %v1538_v54 = vpop.permute.xlu1 %1537  ;;  %v1506_v34 = vpop.permute.xlu0 %1505 }
 0x1a6   : > { %v1847_v9 = vsel %vm1829_vm10, %v1814_v37, %v1538_v54  ;;  %v1831_v14 = vsel %vm1829_vm10, %v1798_v38, %v1506_v34 }
 0x1a7   : > { %1295 = vrot.lane.b32.xlu1 %v4423_v26, %s2630_s5  ;;  %1263 = vrot.lane.b32.xlu0 %v487_v55, %s2630_s5  ;;  %v1634_v55 = vsel %vm1631_vm3, %v1601_v21, %v4426_v44 }
 0x1a8   : > { %2424 = vmatmul.mubr.msk.f32.vlgmr.msra.gmra.mxu0 %vm1867_vm11, %v1831_v14  ;;  %2448 = vmatmul.mubr.msk.f32.vlgmr.msra.gmra.mxu1 %vm1867_vm11, %v1847_v9  ;;  %v1667_v38 = vsel %vm1664_vm5, %v1634_v55, %v3370_v41  ;;  %v4427_v9 = vld [vmem:[#allocation34_spill] sm:$0xff] }
 0x1a9   : > { %v3786_v63 = vpop.permute.xlu1 %1157  ;;  %v3788_v43 = vpop.permute.xlu0 %1125  ;;  %v1700_v34 = vsel %vm1697_vm6, %v1667_v38, %v3613_v12  ;;  %v4428_v14 = vld [vmem:[#allocation38_spill] sm:$0xff]  ;;  %v4431_v38 = vld [vmem:[#allocation37_spill] sm:$0xff] }
 0x1aa   : > { %v1617_v26 = vsel %vm173_vm0, %v4428_v14, %v4427_v9 }
 0x1ab   : > { %1297 = vrot.lane.b32.xlu1 %v4424_v50, %s2630_s5  ;;  %1265 = vrot.lane.b32.xlu0 %v488_v58, %s2630_s5  ;;  %v1733_v58 = vsel %vm1730_vm7, %v1700_v34, %v1124_v20  ;;  %v1650_v41 = vsel %vm1631_vm3, %v1617_v26, %v3281_v40  ;;  %v289_v40 = vld [vmem:[#allocation2 + $0x20] sm:$0xff]  ;;  %v4432_v34 = vld [vmem:[#allocation57_spill] sm:$0xff] }
 0x1ac   : > { %v1683_v12 = vsel %vm1664_vm5, %v1650_v41, %v3496_v53 }
 0x1ad   : > { %v1284_v0 = vpop.permute.xlu1 %1283  ;;  %v1252_v5 = vpop.permute.xlu0 %1251  ;;  %v1716_v20 = vsel %vm1697_vm6, %v1683_v12, %v3709_v52 }
 0x1ae   : > { %v1766_v50 = vsel %vm1763_vm8, %v1733_v58, %v1252_v5  ;;  %v1749_v17 = vsel %vm1730_vm7, %v1716_v20, %v3760_v3  ;;  %v3846_v5 = vld [vmem:[#allocation2 + $0x18c] sm:$0xff] }
 0x1af   : > { %1423 = vrot.lane.b32.xlu1 %v3793_v29, %s2631_s16  ;;  %1391 = vrot.lane.b32.xlu0 %v519_v6, %s2631_s16  ;;  %v1782_v53 = vsel %vm1763_vm8, %v1749_v17, %v1284_v0 }
 0x1b1   : > { %v1286_v16 = vpop.permute.xlu1 %1285  ;;  %v1254_v8 = vpop.permute.xlu0 %1253 }
 0x1b3   : > { %1393 = vrot.lane.b32.xlu1 %v520_v10, %s2631_s16  ;;  %1043 = vrot.lane.b32.xlu0 %v3682_v47, %s2628_s3  ;;  %v3813_v47 = vld [vmem:[#allocation2 + $0x184] sm:$0xff] }
 0x1b5   : > { %v1412_v57 = vpop.permute.xlu1 %1411  ;;  %v1380_v15 = vpop.permute.xlu0 %1379 }
 0x1b6   : > { %v1799_v6 = vsel %vm1796_vm9, %v1766_v50, %v1380_v15  ;;  %v3848_v15 = vld [vmem:[#allocation2 + $0xcc] sm:$0xff]  ;;  %v1815_v52 = vsel %vm1796_vm9, %v1782_v53, %v1412_v57 }
 0x1b7   : > { %1519 = vrot.lane.b32.xlu1 %v3801_v42, %s2632_s27  ;;  %1425 = vrot.lane.b32.xlu0 %v3803_v28, %s2631_s16 }
 0x1b9   : > { %v1382_v37 = vpop.permute.xlu1 %1381  ;;  %v3817_v54 = vpop.permute.xlu0 %1031 }
 0x1bb   : > { %1045 = vrot.lane.b32.xlu1 %v3695_v13, %s2628_s3  ;;  %1551 = vrot.lane.b32.xlu0 %v3813_v47, %s2632_s27 }
 0x1bd   : > { %v1508_v10 = vpop.permute.xlu1 %1507  ;;  %v1414_v1 = vpop.permute.xlu0 %1413 }
 0x1be   : > { %v1832_v13 = vsel %vm1829_vm10, %v1799_v6, %v1508_v10 }
 0x1bf   : > { %1171 = vrot.lane.b32.xlu1 %v3705_v25, %s2629_s4  ;;  %1139 = vrot.lane.b32.xlu0 %v3693_v61, %s2629_s4  ;;  %v4429_v25 = vld [vmem:[#allocation21_spill] sm:$0xff] }
 0x1c0   : > { %2426 = vmatprep.mubr.msk.f32.mxu0 %vm1867_vm11, %v1832_v13  ;;  %v1602_v55 = vsel %vm173_vm0, %v289_v40, %v4429_v25  ;;  %v4430_v61 = vld [vmem:[#allocation33_spill] sm:$0xff] }
 0x1c1   : > { %v3851_v21 = vpop.permute.xlu1 %1033  ;;  %v1540_v3 = vpop.permute.xlu0 %1539  ;;  %v1618_v0 = vsel %vm173_vm0, %v4431_v38, %v4430_v61  ;;  %v1635_v57 = vsel %vm1631_vm3, %v1602_v55, %v4432_v34  ;;  %v3914_v25 = vld [vmem:[#allocation2 + $0x19c] sm:$0xff] }
 0x1c2   : > { %v1848_v44 = vsel %vm1829_vm10, %v1815_v52, %v1540_v3  ;;  %v1651_v9 = vsel %vm1631_vm3, %v1618_v0, %v3279_v39  ;;  %v1668_v14 = vsel %vm1664_vm5, %v1635_v57, %v3368_v27  ;;  %v3908_v52 = vld [vmem:[#allocation2 + $0x1a2] sm:$0xff] }
 0x1c3   : > { %1553 = vrot.lane.b32.xlu1 %v3846_v5, %s2632_s27  ;;  %1521 = vrot.lane.b32.xlu0 %v3848_v15, %s2632_s27  ;;  %v1684_v26 = vsel %vm1664_vm5, %v1651_v9, %v3494_v46  ;;  %v1701_v50 = vsel %vm1697_vm6, %v1668_v14, %v3611_v22  ;;  %v489_v22 = vld [vmem:[#allocation2 + $0xd8] sm:$0xff]  ;;  %v1718_v14 = vsel %vm1697_vm6, %v3507_v60, %v3817_v54 }
 0x1c4   : > { %2450 = vmatprep.mubr.msk.f32.mxu1 %vm1867_vm11, %v1848_v44  ;;  %v1717_v12 = vsel %vm1697_vm6, %v1684_v26, %v3739_v33  ;;  %v1734_v39 = vsel %vm1730_vm7, %v1701_v50, %v3788_v43  ;;  %v3939_v26 = vld [vmem:[#allocation2 + $0x1a4] sm:$0xff] }
 0x1c5   : > { %v1160_v58 = vpop.permute.xlu1 %1159  ;;  %v1128_v41 = vpop.permute.xlu0 %1127  ;;  %v1750_v6 = vsel %vm1730_vm7, %v1717_v12, %v3786_v63  ;;  %v1767_v46 = vsel %vm1763_vm8, %v1734_v39, %v1254_v8  ;;  %v3898_v8 = vld [vmem:[#allocation2 + $0x19a] sm:$0xff]  ;;  %v1703_v12 = vsel %vm1697_vm6, %v3384_v45, %v3619_v59  ;;  %v491_v45 = vld [vmem:[#allocation2 + $0xf0] sm:$0xff] }
 0x1c6   : > { %v1783_v27 = vsel %vm1763_vm8, %v1750_v6, %v1286_v16  ;;  %v1800_v10 = vsel %vm1796_vm9, %v1767_v46, %v1382_v37  ;;  %v521_v37 = vld [vmem:[#allocation2 + $0xda] sm:$0xff]  ;;  %v1719_v6 = vsel %vm1697_vm6, %v3503_v24, %v3851_v21 }
 0x1c7   : > { %1173 = vrot.lane.b32.xlu1 %v3734_v30, %s2629_s4  ;;  %1141 = vrot.lane.b32.xlu0 %v3736_v2, %s2629_s4  ;;  %v1816_v33 = vsel %vm1796_vm9, %v1783_v27, %v1414_v1  ;;  %v490_v30 = vld [vmem:[#allocation2 + $0xe0] sm:$0xff] }
 0x1c9   : > { %v1542_v20 = vpop.permute.xlu1 %1541  ;;  %v1510_v63 = vpop.permute.xlu0 %1509 }
 0x1ca   : > { %v1849_v13 = vsel %vm1829_vm10, %v1816_v33, %v1542_v20  ;;  %v1833_v43 = vsel %vm1829_vm10, %v1800_v10, %v1510_v63  ;;  %v507_v10 = vld [vmem:[#allocation2 + $0x1b0] sm:$0xff] }
 0x1cb   : > { %1299 = vrot.lane.b32.xlu1 %v3205_v56, %s2630_s5  ;;  %1267 = vrot.lane.b32.xlu0 %v489_v22, %s2630_s5  ;;  %v522_v56 = vld [vmem:[#allocation2 + $0xe2] sm:$0xff] }
 0x1cc   : > { %2427 = vmatmul.mubr.msk.f32.gmra.mxu0 %vm1867_vm11, %v1833_v43  ;;  %2451 = vmatmul.mubr.msk.f32.gmra.mxu1 %vm1867_vm11, %v1849_v13 }
 0x1cd   : > { %v1162_v2 = vpop.permute.xlu1 %1161  ;;  %v1130_v16 = vpop.permute.xlu0 %1129 }
 0x1ce   : > { %v1752_v39 = vsel %vm1730_vm7, %v1719_v6, %v1162_v2  ;;  %v1736_v27 = vsel %vm1730_vm7, %v1703_v12, %v1130_v16  ;;  %v523_v2 = vld [vmem:[#allocation2 + $0xf2] sm:$0xff] }
 0x1cf   : > { %1301 = vrot.lane.b32.xlu1 %v3203_v11, %s2630_s5  ;;  %1269 = vrot.lane.b32.xlu0 %v490_v30, %s2630_s5  ;;  %v3906_v11 = vld [vmem:[#allocation2 + $0xdc] sm:$0xff]  ;;  %v539_v30 = vld [vmem:[#allocation2 + $0x1b2] sm:$0xff] }
 0x1d1   : > { %v1288_v1 = vpop.permute.xlu1 %1287  ;;  %v1256_v17 = vpop.permute.xlu0 %1255 }
 0x1d3   : > { %1427 = vrot.lane.b32.xlu1 %v3898_v8, %s2631_s16  ;;  %1395 = vrot.lane.b32.xlu0 %v521_v37, %s2631_s16 }
 0x1d5   : > { %v1290_v40 = vpop.permute.xlu1 %1289  ;;  %v1258_v53 = vpop.permute.xlu0 %1257 }
 0x1d6   : > { %v1785_v46 = vsel %vm1763_vm8, %v1752_v39, %v1290_v40  ;;  %v1769_v22 = vsel %vm1763_vm8, %v1736_v27, %v1258_v53  ;;  %v555_v40 = vld [vmem:[#allocation2 + $0xf4] sm:$0xff]  ;;  %v509_v27 = vld [vmem:[#allocation2 + $0x1c8] sm:$0xff] }
 0x1d7   : > { %1397 = vrot.lane.b32.xlu1 %v522_v56, %s2631_s16  ;;  %1047 = vrot.lane.b32.xlu0 %v3793_v29, %s2628_s3  ;;  %v1702_v29 = vsel %vm1697_vm6, %v3388_v32, %v3621_v18  ;;  %v1751_v18 = vsel %vm1730_vm7, %v1718_v14, %v1160_v58  ;;  %v540_v53 = vld [vmem:[#allocation2 + $0x1ba] sm:$0xff] }
 0x1d8   : > { %v1735_v38 = vsel %vm1730_vm7, %v1702_v29, %v1128_v41  ;;  %v3941_v41 = vld [vmem:[#allocation2 + $0xe4] sm:$0xff] }
 0x1d9   : > { %v1416_v3 = vpop.permute.xlu1 %1415  ;;  %v1384_v44 = vpop.permute.xlu0 %1383  ;;  %v1768_v0 = vsel %vm1763_vm8, %v1735_v38, %v1256_v17 }
 0x1da   : > { %v1801_v34 = vsel %vm1796_vm9, %v1768_v0, %v1384_v44  ;;  %v1704_v0 = vsel %vm1697_vm6, %v3400_v23, %v3627_v49 }
 0x1db   : > { %1523 = vrot.lane.b32.xlu1 %v3906_v11, %s2632_s27  ;;  %1429 = vrot.lane.b32.xlu0 %v3908_v52, %s2631_s16 }
 0x1dd   : > { %v1386_v55 = vpop.permute.xlu1 %1385  ;;  %v3916_v61 = vpop.permute.xlu0 %1035 }
 0x1de   : > { %v1802_v59 = vsel %vm1796_vm9, %v1769_v22, %v1386_v55  ;;  %v571_v55 = vld [vmem:[#allocation2 + $0x1b4] sm:$0xff] }
 0x1df   : > { %1049 = vrot.lane.b32.xlu1 %v3803_v28, %s2628_s3  ;;  %1555 = vrot.lane.b32.xlu0 %v3914_v25, %s2632_s27  ;;  %v1784_v28 = vsel %vm1763_vm8, %v1751_v18, %v1288_v1  ;;  %v524_v1 = vld [vmem:[#allocation2 + $0xfa] sm:$0xff] }
 0x1e0   : > { %v1817_v60 = vsel %vm1796_vm9, %v1784_v28, %v1416_v3  ;;  %v556_v28 = vld [vmem:[#allocation2 + $0xfc] sm:$0xff] }
 0x1e1   : > { %v1512_v57 = vpop.permute.xlu1 %1511  ;;  %v1418_v9 = vpop.permute.xlu0 %1417 }
 0x1e2   : > { %v1834_v32 = vsel %vm1829_vm10, %v1801_v34, %v1512_v57  ;;  %v1818_v24 = vsel %vm1796_vm9, %v1785_v46, %v1418_v9 }
 0x1e3   : > { %1175 = vrot.lane.b32.xlu1 %v3813_v47, %s2629_s4  ;;  %1143 = vrot.lane.b32.xlu0 %v3801_v42, %s2629_s4 }
 0x1e4   : > { %2429 = vmatprep.mubr.msk.f32.mxu0 %vm1867_vm11, %v1834_v32  ;;  %v1720_v32 = vsel %vm1697_vm6, %v3518_v36, %v3916_v61 }
 0x1e5   : > { %v3944_v54 = vpop.permute.xlu1 %1037  ;;  %v1544_v50 = vpop.permute.xlu0 %1543 }
 0x1e6   : > { %v1850_v58 = vsel %vm1829_vm10, %v1817_v60, %v1544_v50 }
 0x1e7   : > { %1557 = vrot.lane.b32.xlu1 %v3939_v26, %s2632_s27  ;;  %1525 = vrot.lane.b32.xlu0 %v3941_v41, %s2632_s27 }
 0x1e8   : > { %2453 = vmatprep.mubr.msk.f32.mxu1 %vm1867_vm11, %v1850_v58  ;;  %v1705_v58 = vsel %vm1697_vm6, %v3396_v7, %v3625_v48  ;;  %v493_v7 = vld [vmem:[#allocation2 + $0x108] sm:$0xff] }
 0x1e9   : > { %v1164_v42 = vpop.permute.xlu1 %1163  ;;  %v1132_v47 = vpop.permute.xlu0 %1131 }
 0x1ea   : > { %v1737_v34 = vsel %vm1730_vm7, %v1704_v0, %v1132_v47  ;;  %v1753_v23 = vsel %vm1730_vm7, %v1720_v32, %v1164_v42  ;;  %v1721_v42 = vsel %vm1697_vm6, %v3514_v19, %v3944_v54 }
 0x1eb   : > { %1177 = vrot.lane.b32.xlu1 %v3846_v5, %s2629_s4  ;;  %1145 = vrot.lane.b32.xlu0 %v3848_v15, %s2629_s4  ;;  %v508_v5 = vld [vmem:[#allocation2 + $0x1b8] sm:$0xff] }
 0x1ec   : > { %v492_v15 = vld [vmem:[#allocation2 + $0xf8] sm:$0xff] }
 0x1ed   : > { %v1546_v21 = vpop.permute.xlu1 %1545  ;;  %v1514_v33 = vpop.permute.xlu0 %1513 }
 0x1ee   : > { %v1851_v20 = vsel %vm1829_vm10, %v1818_v24, %v1546_v21  ;;  %v1835_v63 = vsel %vm1829_vm10, %v1802_v59, %v1514_v33  ;;  %v541_v24 = vld [vmem:[#allocation2 + $0x1ca] sm:$0xff] }
 0x1ef   : > { %1303 = vrot.lane.b32.xlu1 %v507_v10, %s2630_s5  ;;  %1271 = vrot.lane.b32.xlu0 %v491_v45, %s2630_s5  ;;  %v525_v21 = vld [vmem:[#allocation2 + $0x10a] sm:$0xff] }
 0x1f0   : > { %2430 = vmatmul.mubr.msk.f32.gmra.mxu0 %vm1867_vm11, %v1835_v63  ;;  %2454 = vmatmul.mubr.msk.f32.gmra.mxu1 %vm1867_vm11, %v1851_v20  ;;  %v542_v63 = vld [vmem:[#allocation2 + $0x1d2] sm:$0xff] }
 0x1f1   : > { %v1166_v13 = vpop.permute.xlu1 %1165  ;;  %v1134_v43 = vpop.permute.xlu0 %1133 }
 0x1f2   : > { %v1754_v47 = vsel %vm1730_vm7, %v1721_v42, %v1166_v13  ;;  %v1738_v12 = vsel %vm1730_vm7, %v1705_v58, %v1134_v43  ;;  %v573_v43 = vld [vmem:[#allocation2 + $0x1cc] sm:$0xff] }
 0x1f3   : > { %1305 = vrot.lane.b32.xlu1 %v508_v5, %s2630_s5  ;;  %1273 = vrot.lane.b32.xlu0 %v492_v15, %s2630_s5  ;;  %v526_v5 = vld [vmem:[#allocation2 + $0x112] sm:$0xff] }
 0x1f5   : > { %v1292_v16 = vpop.permute.xlu1 %1291  ;;  %v1260_v37 = vpop.permute.xlu0 %1259 }
 0x1f6   : > { %v1786_v49 = vsel %vm1763_vm8, %v1753_v23, %v1292_v16 }
 0x1f7   : > { %1431 = vrot.lane.b32.xlu1 %v539_v30, %s2631_s16  ;;  %1399 = vrot.lane.b32.xlu0 %v523_v2, %s2631_s16  ;;  %v557_v30 = vld [vmem:[#allocation2 + $0x10c] sm:$0xff] }
 0x1f9   : > { %v1294_v17 = vpop.permute.xlu1 %1293  ;;  %v1262_v56 = vpop.permute.xlu0 %1261 }
 0x1fa   : > { %v1787_v6 = vsel %vm1763_vm8, %v1754_v47, %v1294_v17  ;;  %v1771_v39 = vsel %vm1763_vm8, %v1738_v12, %v1262_v56 }
 0x1fb   : > { %1401 = vrot.lane.b32.xlu1 %v524_v1, %s2631_s16  ;;  %1051 = vrot.lane.b32.xlu0 %v3898_v8, %s2628_s3  ;;  %v1770_v8 = vsel %vm1763_vm8, %v1737_v34, %v1260_v37  ;;  %v574_v37 = vld [vmem:[#allocation2 + $0x1d4] sm:$0xff] }
 0x1fc   : > { %v558_v1 = vld [vmem:[#allocation2 + $0x114] sm:$0xff] }
 0x1fd   : > { %v1420_v3 = vpop.permute.xlu1 %1419  ;;  %v1388_v44 = vpop.permute.xlu0 %1387 }
 0x1fe   : > { %v1803_v57 = vsel %vm1796_vm9, %v1770_v8, %v1388_v44  ;;  %v1819_v60 = vsel %vm1796_vm9, %v1786_v49, %v1420_v3 }
 0x1ff   : > { %1527 = vrot.lane.b32.xlu1 %v555_v40, %s2632_s27  ;;  %1433 = vrot.lane.b32.xlu0 %v540_v53, %s2631_s16  ;;  %v1706_v40 = vsel %vm1697_vm6, %v3420_v35, %v3635_v62 }
 0x201   : > { %v1390_v29 = vpop.permute.xlu1 %1389  ;;  %v3983_v38 = vpop.permute.xlu0 %1039 }
 0x202   : > { %v1804_v48 = vsel %vm1796_vm9, %v1771_v39, %v1390_v29  ;;  %v1722_v0 = vsel %vm1697_vm6, %v3538_v4, %v3983_v38  ;;  %v1707_v4 = vsel %vm1697_vm6, %v3417_v51, %v3633_v31  ;;  %v4433_v38 = vld [vmem:[#allocation24_spill] sm:$0xff] }
 0x203   : > { %1053 = vrot.lane.b32.xlu1 %v3908_v52, %s2628_s3  ;;  %1559 = vrot.lane.b32.xlu0 %v571_v55, %s2632_s27  ;;  %v572_v52 = vld [vmem:[#allocation2 + $0x1bc] sm:$0xff]  ;;  %s4109_s3 = scalar_lea.vmem [#allocation3], %s2333_s30 }
 0x205   : > { %v1516_v9 = vpop.permute.xlu1 %1515  ;;  %v1422_v14 = vpop.permute.xlu0 %1421 }
 0x206   : > { %v1836_v18 = vsel %vm1829_vm10, %v1803_v57, %v1516_v9  ;;  %v1820_v19 = vsel %vm1796_vm9, %v1787_v6, %v1422_v14 }
 0x207   : > { %1179 = vrot.lane.b32.xlu1 %v3914_v25, %s2629_s4  ;;  %1147 = vrot.lane.b32.xlu0 %v3906_v11, %s2629_s4 }
 0x208   : > { %2432 = vmatprep.mubr.msk.f32.mxu0 %vm1867_vm11, %v1836_v18 }
 0x209   : > { %v4006_v50 = vpop.permute.xlu1 %1041  ;;  %v1548_v36 = vpop.permute.xlu0 %1547 }
 0x20a   : > { %v1852_v61 = vsel %vm1829_vm10, %v1819_v60, %v1548_v36  ;;  %v1723_v23 = vsel %vm1697_vm6, %v4433_v38, %v4006_v50 }
 0x20b   : > { %1561 = vrot.lane.b32.xlu1 %v572_v52, %s2632_s27  ;;  %1529 = vrot.lane.b32.xlu0 %v556_v28, %s2632_s27 }
 0x20c   : > { %2456 = vmatprep.mubr.msk.f32.mxu1 %vm1867_vm11, %v1852_v61 }
 0x20d   : > { %v1168_v11 = vpop.permute.xlu1 %1167  ;;  %v1136_v25 = vpop.permute.xlu0 %1135 }
 0x20e   : > { %v1739_v53 = vsel %vm1730_vm7, %v1706_v40, %v1136_v25  ;;  %v1755_v35 = vsel %vm1730_vm7, %v1722_v0, %v1168_v11 }
 0x20f   : > { %1181 = vrot.lane.b32.xlu1 %v3939_v26, %s2629_s4  ;;  %1149 = vrot.lane.b32.xlu0 %v3941_v41, %s2629_s4  ;;  %v510_v26 = vld [vmem:[#allocation2 + $0x1d0] sm:$0xff]  ;;  %s2375_s4 = sshll.u32 %s2614_s12, 12  ;;  %s4214_s12 = scalar_lea.sflag [#allocation4], %s161_s28 }
 0x210   : > { %v494_v41 = vld [vmem:[#allocation2 + $0x110] sm:$0xff]  ;;  %s4204_s8 = scalar_lea.hbm %s4262_s2, %s2375_s4 }
 0x211   : > { %v1550_v54 = vpop.permute.xlu1 %1549  ;;  %v1518_v46 = vpop.permute.xlu0 %1517 }
 0x212   : > { %v1853_v22 = vsel %vm1829_vm10, %v1820_v19, %v1550_v54  ;;  %v1837_v10 = vsel %vm1829_vm10, %v1804_v48, %v1518_v46  ;;  %v4434_v19 = vld [vmem:[#allocation46_spill] sm:$0xff]  ;;  %v4435_v54 = vld [vmem:[#allocation60_spill] sm:$0xff] }
 0x213   : > { %1307 = vrot.lane.b32.xlu1 %v509_v27, %s2630_s5  ;;  %1275 = vrot.lane.b32.xlu0 %v493_v7, %s2630_s5  ;;  %v1708_v46 = vsel %vm1697_vm6, %v4435_v54, %v4434_v19 }
 0x214   : > { %2433 = vmatmul.mubr.msk.f32.gmra.mxu0 %vm1867_vm11, %v1837_v10  ;;  %2457 = vmatmul.mubr.msk.f32.gmra.mxu1 %vm1867_vm11, %v1853_v22 }
 0x215   : > { %v1170_v45 = vpop.permute.xlu1 %1169  ;;  %v1138_v59 = vpop.permute.xlu0 %1137 }
 0x216   : > { %v1756_v49 = vsel %vm1730_vm7, %v1723_v23, %v1170_v45  ;;  %v1740_v52 = vsel %vm1730_vm7, %v1707_v4, %v1138_v59  ;;  %v4436_v59 = vld [vmem:[#allocation13_spill] sm:$0xff] }
 0x217   : > { %1309 = vrot.lane.b32.xlu1 %v510_v26, %s2630_s5  ;;  %1277 = vrot.lane.b32.xlu0 %v494_v41, %s2630_s5  ;;  %s2240_s5 = sshll.u32 %s4109_s3, 4  ;;  %s4208_s5 = int_to_ptr.vmem [resolvable:$true] %s2240_s5 }
 0x218   : > { %s2546_s15 = scalar_lea.vmem %s4208_s5, 4096 }
 0x219   : > { %v1296_v33 = vpop.permute.xlu1 %1295  ;;  %v1264_v20 = vpop.permute.xlu0 %1263  ;;  %p2547_p12 = scmp.ne.s32.totalorder %s4208_s5, %s2546_s15 }
 0x21a   : > { %v1772_v3 = vsel %vm1763_vm8, %v1739_v53, %v1264_v20  ;;  %v1788_v62 = vsel %vm1763_vm8, %v1755_v35, %v1296_v33 }
 0x21b   : > { %1435 = vrot.lane.b32.xlu1 %v541_v24, %s2631_s16  ;;  %1403 = vrot.lane.b32.xlu0 %v525_v21, %s2631_s16  ;;  %p2548_p13 = pnand %p2547_p12, %p2690_p4 }
 0x21d   : > { %v1298_v15 = vpop.permute.xlu1 %1297  ;;  %v1266_v13 = vpop.permute.xlu0 %1265  ;;  %p2549_p0 = pneg %p2548_p13 }
 0x21e   : > { %v1789_v28 = vsel %vm1763_vm8, %v1756_v49, %v1298_v15  ;;  %v1773_v60 = vsel %vm1763_vm8, %v1740_v52, %v1266_v13 }
 0x21f   : > { %1437 = vrot.lane.b32.xlu1 %v542_v63, %s2631_s16  ;;  %1405 = vrot.lane.b32.xlu0 %v526_v5, %s2631_s16  ;;  %s2633_s16 = smov [#allocation3]  }
 0x220   : > { %s2550_s18 = sshll.u32 %s2633_s16, 4  ;;  %s2551_s18 = int_to_ptr.vmem [resolvable:$false] %s2550_s18 }
 0x221   : > { %v1424_v2 = vpop.permute.xlu1 %1423  ;;  %v1392_v16 = vpop.permute.xlu0 %1391  ;;  %s2552_s20 = scalar_lea.vmem %s2551_s18, 8192  ;;  %p2553_p1 = scmp.lt.s32.totalorder %s4208_s5, %s2551_s18 }
 0x222   : > { %v1805_v44 = vsel %vm1796_vm9, %v1772_v3, %v1392_v16  ;;  %v1821_v8 = vsel %vm1796_vm9, %v1788_v62, %v1424_v2  ;;  %v4437_v2 = vld [vmem:[#allocation32_spill] sm:$0xff]  ;;  %v4438_v16 = vld [vmem:[#allocation59_spill] sm:$0xff]  ;;  %p2554_p2 = scmp.lt.s32.totalorder %s2552_s20, %s2546_s15 }
 0x223   : > { %1563 = vrot.lane.b32.xlu1 %v573_v43, %s2632_s27  ;;  %1531 = vrot.lane.b32.xlu0 %v557_v30, %s2632_s27 }
 0x224   : > { %p2555_p3 = por %p2554_p2, %p2553_p1 }
 0x225   : > { %v1394_v17 = vpop.permute.xlu1 %1393  ;;  %v1044_v56 = vpop.permute.xlu0 %1043 }
 0x226   : > { %v1806_v36 = vsel %vm1796_vm9, %v1773_v60, %v1394_v17  ;;  %v1724_v24 = vsel %vm1697_vm6, %v4436_v59, %v1044_v56  ;;  %p2556_p5 = pnand %p2555_p3, %p2549_p0 }
 0x227   : > { %1565 = vrot.lane.b32.xlu1 %v574_v37, %s2632_s27  ;;  %1533 = vrot.lane.b32.xlu0 %v558_v1, %s2632_s27  ;;  %v1709_v37 = vsel %vm1697_vm6, %v4438_v16, %v4437_v2  ;;  %v4439_v1 = vld [vmem:[#allocation28_spill] sm:$0xff] }
 0x229   : > { %v1520_v55 = vpop.permute.xlu1 %1519  ;;  %v1426_v29 = vpop.permute.xlu0 %1425 }
 0x22a   : > { %v1838_v34 = vsel %vm1829_vm10, %v1805_v44, %v1520_v55  ;;  %v1822_v61 = vsel %vm1796_vm9, %v1789_v28, %v1426_v29 }
 0x22b   : > { %2435 = vmatprep.mubr.msk.f32.mxu0 %vm1867_vm11, %v1838_v34 }
 0x22d   : > { %v1046_v57 = vpop.permute.xlu1 %1045  ;;  %v1552_v9 = vpop.permute.xlu0 %1551 }
 0x22e   : > { %v1854_v14 = vsel %vm1829_vm10, %v1821_v8, %v1552_v9  ;;  %v1725_v17 = vsel %vm1697_vm6, %v4439_v1, %v1046_v57 }
 0x22f   : > { %2459 = vmatprep.mubr.msk.f32.mxu1 %vm1867_vm11, %v1854_v14 }
 0x231   : > { %v1172_v32 = vpop.permute.xlu1 %1171  ;;  %v1140_v18 = vpop.permute.xlu0 %1139 }
 0x232   : > { %v1741_v22 = vsel %vm1730_vm7, %v1708_v46, %v1140_v18  ;;  %v1757_v33 = vsel %vm1730_vm7, %v1724_v24, %v1172_v32 }
 0x235   : > { %v1554_v11 = vpop.permute.xlu1 %1553  ;;  %v1522_v25 = vpop.permute.xlu0 %1521 }
 0x236   : > { %v1855_v51 = vsel %vm1829_vm10, %v1822_v61, %v1554_v11  ;;  %v1839_v31 = vsel %vm1829_vm10, %v1806_v36, %v1522_v25  ;;  %v4440_v36 = vld [vmem:[#allocation7_spill] sm:$0xff]  ;;  %v4441_v61 = vld [vmem:[#allocation9_spill] sm:$0xff] }
 0x237   : > { %2436 = vmatmul.mubr.msk.f32.gmra.mxu0 %vm1867_vm11, %v1839_v31  ;;  %2460 = vmatmul.mubr.msk.f32.gmra.mxu1 %vm1867_vm11, %v1855_v51  ;;  %v1710_v11 = vsel %vm1697_vm6, %v4441_v61, %v4440_v36  ;;  %v4451_v61 = vld [vmem:[#allocation31_spill] sm:$0xff] }
 0x239   : > { %v1174_v50 = vpop.permute.xlu1 %1173  ;;  %v1142_v58 = vpop.permute.xlu0 %1141 }
 0x23a   : > { %v1758_v56 = vsel %vm1730_vm7, %v1725_v17, %v1174_v50  ;;  %v1742_v40 = vsel %vm1730_vm7, %v1709_v37, %v1142_v58 }
 0x23d   : > { %v1300_v42 = vpop.permute.xlu1 %1299  ;;  %v1268_v47 = vpop.permute.xlu0 %1267 }
 0x23e   : > { %v1774_v10 = vsel %vm1763_vm8, %v1741_v22, %v1268_v47  ;;  %v1790_v20 = vsel %vm1763_vm8, %v1757_v33, %v1300_v42  ;;  %v4442_v42 = vld [vmem:[#allocation25_spill] sm:$0xff] }
 0x241   : > { %v1302_v12 = vpop.permute.xlu1 %1301  ;;  %v1270_v6 = vpop.permute.xlu0 %1269 }
 0x242   : > { %v1791_v53 = vsel %vm1763_vm8, %v1758_v56, %v1302_v12  ;;  %v1775_v3 = vsel %vm1763_vm8, %v1742_v40, %v1270_v6 }
 0x245   : > { %v1428_v39 = vpop.permute.xlu1 %1427  ;;  %v1396_v27 = vpop.permute.xlu0 %1395 }
 0x246   : > { %v1807_v26 = vsel %vm1796_vm9, %v1774_v10, %v1396_v27  ;;  %v1823_v63 = vsel %vm1796_vm9, %v1790_v20, %v1428_v39  ;;  %v4443_v10 = vld [vmem:[#allocation45_spill] sm:$0xff] }
 0x249   : > { %v1398_v7 = vpop.permute.xlu1 %1397  ;;  %v1048_v48 = vpop.permute.xlu0 %1047 }
 0x24a   : > { %v1808_v44 = vsel %vm1796_vm9, %v1775_v3, %v1398_v7  ;;  %v1726_v47 = vsel %vm1697_vm6, %v4442_v42, %v1048_v48  ;;  %v4444_v48 = vld [vmem:[#allocation14_spill] sm:$0xff] }
 0x24d   : > { %v1524_v41 = vpop.permute.xlu1 %1523  ;;  %v1430_v45 = vpop.permute.xlu0 %1429 }
 0x24e   : > { %v1840_v21 = vsel %vm1829_vm10, %v1807_v26, %v1524_v41  ;;  %v1824_v55 = vsel %vm1796_vm9, %v1791_v53, %v1430_v45  ;;  %v1711_v26 = vsel %vm1697_vm6, %v4444_v48, %v4443_v10  ;;  %v4445_v41 = vld [vmem:[#allocation8_spill] sm:$0xff] }
 0x24f   : > { %2438 = vmatprep.mubr.msk.f32.mxu0 %vm1867_vm11, %v1840_v21 }
 0x251   : > { %v1050_v5 = vpop.permute.xlu1 %1049  ;;  %v1556_v15 = vpop.permute.xlu0 %1555 }
 0x252   : > { %v1856_v13 = vsel %vm1829_vm10, %v1823_v63, %v1556_v15  ;;  %v1727_v45 = vsel %vm1697_vm6, %v4445_v41, %v1050_v5 }
 0x253   : > { %2462 = vmatprep.mubr.msk.f32.mxu1 %vm1867_vm11, %v1856_v13 }
 0x255   : > { %v1176_v43 = vpop.permute.xlu1 %1175  ;;  %v1144_v30 = vpop.permute.xlu0 %1143 }
 0x256   : > { %v1743_v25 = vsel %vm1730_vm7, %v1710_v11, %v1144_v30  ;;  %v1759_v6 = vsel %vm1730_vm7, %v1726_v47, %v1176_v43 }
 0x259   : > { %v1558_v29 = vpop.permute.xlu1 %1557  ;;  %v1526_v0 = vpop.permute.xlu0 %1525 }
 0x25a   : > { %v1857_v34 = vsel %vm1829_vm10, %v1824_v55, %v1558_v29  ;;  %v1841_v35 = vsel %vm1829_vm10, %v1808_v44, %v1526_v0 }
 0x25b   : > { %2439 = vmatmul.mubr.msk.f32.gmra.mxu0 %vm1867_vm11, %v1841_v35  ;;  %2463 = vmatmul.mubr.msk.f32.gmra.mxu1 %vm1867_vm11, %v1857_v34  ;;  %v4446_v34 = vld [vmem:[#allocation6_spill] sm:$0xff]  ;;  %v4447_v35 = vld [vmem:[#allocation27_spill] sm:$0xff] }
 0x25d   : > { %v1178_v62 = vpop.permute.xlu1 %1177  ;;  %v1146_v8 = vpop.permute.xlu0 %1145 }
 0x25e   : > { %v1760_v59 = vsel %vm1730_vm7, %v1727_v45, %v1178_v62  ;;  %v1744_v24 = vsel %vm1730_vm7, %v1711_v26, %v1146_v8  ;;  %v1712_v62 = vsel %vm1697_vm6, %v4447_v35, %v4446_v34  ;;  %v4448_v8 = vld [vmem:[#allocation26_spill] sm:$0xff] }
 0x261   : > { %v1304_v57 = vpop.permute.xlu1 %1303  ;;  %v1272_v9 = vpop.permute.xlu0 %1271 }
 0x262   : > { %v1776_v51 = vsel %vm1763_vm8, %v1743_v25, %v1272_v9  ;;  %v1792_v39 = vsel %vm1763_vm8, %v1759_v6, %v1304_v57 }
 0x265   : > { %v1306_v14 = vpop.permute.xlu1 %1305  ;;  %v1274_v32 = vpop.permute.xlu0 %1273 }
 0x266   : > { %v1793_v21 = vsel %vm1763_vm8, %v1760_v59, %v1306_v14  ;;  %v1777_v33 = vsel %vm1763_vm8, %v1744_v24, %v1274_v32 }
 0x268   : > { %v2425_v18 = vpop.f32.mrf.mxu0  ;;  %v2449_v4 = vpop.f32.mrf.mxu1 }
 0x269   : > { %2194 = vst [vmem:[%s4109_s3 + $0x8] sm:$0xff] %v2425_v18  ;;  %2210 = vst [vmem:[%s4109_s3 + $0x88] sm:$0xff] %v2449_v4  ;;  %v1432_v38 = vpop.permute.xlu1 %1431  ;;  %v1400_v23 = vpop.permute.xlu0 %1399 }
 0x26a   : > { %v2034_v49 = vpop.f32.mrf.mxu0  ;;  %v2114_v52 = vpop.f32.mrf.mxu1  ;;  %v1809_v31 = vsel %vm1796_vm9, %v1776_v51, %v1400_v23  ;;  %v1825_v27 = vsel %vm1796_vm9, %v1792_v39, %v1432_v38 }
 0x26b   : > { %2193 = vst [vmem:[%s4109_s3] sm:$0xff] %v2034_v49  ;;  %2209 = vst [vmem:[%s4109_s3 + $0x80] sm:$0xff] %v2114_v52  ;;  %v4449_v52 = vld [vmem:[#allocation11_spill] sm:$0xff] }
 0x26d   : > { %v1402_v28 = vpop.permute.xlu1 %1401  ;;  %v1052_v60 = vpop.permute.xlu0 %1051 }
 0x26e   : > { %v1810_v20 = vsel %vm1796_vm9, %v1777_v33, %v1402_v28  ;;  %v1728_v57 = vsel %vm1697_vm6, %v4448_v8, %v1052_v60  ;;  %v4450_v28 = vld [vmem:[#allocation23_spill] sm:$0xff] }
 0x26f   : > { %v1713_v36 = vsel %vm1697_vm6, %v4450_v28, %v4449_v52 }
 0x271   : > { %v1528_v50 = vpop.permute.xlu1 %1527  ;;  %v1434_v58 = vpop.permute.xlu0 %1433 }
 0x272   : > { %v1842_v12 = vsel %vm1829_vm10, %v1809_v31, %v1528_v50  ;;  %v1826_v63 = vsel %vm1796_vm9, %v1793_v21, %v1434_v58 }
 0x273   : > { %2441 = vmatprep.mubr.msk.f32.mxu0 %vm1867_vm11, %v1842_v12 }
 0x275   : > { %v1054_v7 = vpop.permute.xlu1 %1053  ;;  %v1560_v19 = vpop.permute.xlu0 %1559 }
 0x276   : > { %v1858_v54 = vsel %vm1829_vm10, %v1825_v27, %v1560_v19  ;;  %v1729_v60 = vsel %vm1697_vm6, %v4451_v61, %v1054_v7 }
 0x277   : > { %2465 = vmatprep.mubr.msk.f32.mxu1 %vm1867_vm11, %v1858_v54 }
 0x279   : > { %v1180_v46 = vpop.permute.xlu1 %1179  ;;  %v1148_v22 = vpop.permute.xlu0 %1147 }
 0x27a   : > { %v1761_v9 = vsel %vm1730_vm7, %v1728_v57, %v1180_v46  ;;  %v1745_v14 = vsel %vm1730_vm7, %v1712_v62, %v1148_v22 }
 0x27d   : > { %v1562_v15 = vpop.permute.xlu1 %1561  ;;  %v1530_v13 = vpop.permute.xlu0 %1529 }
 0x27e   : > { %v1859_v43 = vsel %vm1829_vm10, %v1826_v63, %v1562_v15  ;;  %v1843_v5 = vsel %vm1829_vm10, %v1810_v20, %v1530_v13 }
 0x27f   : > { %2442 = vmatmul.mubr.msk.f32.gmra.mxu0 %vm1867_vm11, %v1843_v5  ;;  %2466 = vmatmul.mubr.msk.f32.gmra.mxu1 %vm1867_vm11, %v1859_v43 }
 0x281   : > { %v1182_v30 = vpop.permute.xlu1 %1181  ;;  %v1150_v2 = vpop.permute.xlu0 %1149 }
 0x282   : > { %v1762_v51 = vsel %vm1730_vm7, %v1729_v60, %v1182_v30  ;;  %v1746_v31 = vsel %vm1730_vm7, %v1713_v36, %v1150_v2 }
 0x285   : > { %v1308_v16 = vpop.permute.xlu1 %1307  ;;  %v1276_v37 = vpop.permute.xlu0 %1275 }
 0x286   : > { %v1794_v32 = vsel %vm1763_vm8, %v1761_v9, %v1308_v16  ;;  %v1778_v18 = vsel %vm1763_vm8, %v1745_v14, %v1276_v37 }
 0x289   : > { %v1310_v1 = vpop.permute.xlu1 %1309  ;;  %v1278_v17 = vpop.permute.xlu0 %1277 }
 0x28a   : > { %v1795_v50 = vsel %vm1763_vm8, %v1762_v51, %v1310_v1  ;;  %v1779_v58 = vsel %vm1763_vm8, %v1746_v31, %v1278_v17 }
 0x28c   : > { %v2428_v56 = vpop.f32.mrf.mxu0  ;;  %v2452_v40 = vpop.f32.mrf.mxu1 }
 0x28d   : > { %2196 = vst [vmem:[%s4109_s3 + $0x18] sm:$0xff] %v2428_v56  ;;  %2212 = vst [vmem:[%s4109_s3 + $0x98] sm:$0xff] %v2452_v40  ;;  %v1436_v53 = vpop.permute.xlu1 %1435  ;;  %v1404_v3 = vpop.permute.xlu0 %1403 }
 0x28e   : > { %v2044_v44 = vpop.f32.mrf.mxu0  ;;  %v2124_v55 = vpop.f32.mrf.mxu1  ;;  %v1827_v4 = vsel %vm1796_vm9, %v1794_v32, %v1436_v53  ;;  %v1811_v38 = vsel %vm1796_vm9, %v1778_v18, %v1404_v3 }
 0x28f   : > { %2195 = vst [vmem:[%s4109_s3 + $0x10] sm:$0xff] %v2044_v44  ;;  %2211 = vst [vmem:[%s4109_s3 + $0x90] sm:$0xff] %v2124_v55 }
 0x291   : > { %v1438_v29 = vpop.permute.xlu1 %1437  ;;  %v1406_v0 = vpop.permute.xlu0 %1405 }
 0x292   : > { %v1828_v42 = vsel %vm1796_vm9, %v1795_v50, %v1438_v29  ;;  %v1812_v47 = vsel %vm1796_vm9, %v1779_v58, %v1406_v0 }
 0x295   : > { %v1564_v23 = vpop.permute.xlu1 %1563  ;;  %v1532_v49 = vpop.permute.xlu0 %1531 }
 0x296   : > { %v1860_v11 = vsel %vm1829_vm10, %v1827_v4, %v1564_v23  ;;  %v1844_v25 = vsel %vm1829_vm10, %v1811_v38, %v1532_v49 }
 0x297   : > { %2444 = vmatprep.mubr.msk.f32.mxu0 %vm1867_vm11, %v1844_v25  ;;  %2468 = vmatprep.mubr.msk.f32.mxu1 %vm1867_vm11, %v1860_v11 }
 0x299   : > { %v1566_v12 = vpop.permute.xlu1 %1565  ;;  %v1534_v6 = vpop.permute.xlu0 %1533 }
 0x29a   : > { %v1861_v39 = vsel %vm1829_vm10, %v1828_v42, %v1566_v12  ;;  %v1845_v27 = vsel %vm1829_vm10, %v1812_v47, %v1534_v6 }
 0x29b   : > { %2445 = vmatmul.mubr.msk.f32.gmra.mxu0 %vm1867_vm11, %v1845_v27  ;;  %2469 = vmatmul.mubr.msk.f32.gmra.mxu1 %vm1867_vm11, %v1861_v39 }
 0x2b0   : > { %v2431_v7 = vpop.f32.mrf.mxu0  ;;  %v2455_v19 = vpop.f32.mrf.mxu1 }
 0x2b1   : > { %2198 = vst [vmem:[%s4109_s3 + $0x28] sm:$0xff] %v2431_v7  ;;  %2214 = vst [vmem:[%s4109_s3 + $0xa8] sm:$0xff] %v2455_v19 }
 0x2b2   : > { %v2054_v54 = vpop.f32.mrf.mxu0  ;;  %v2134_v46 = vpop.f32.mrf.mxu1 }
 0x2b3   : > { %2197 = vst [vmem:[%s4109_s3 + $0x20] sm:$0xff] %v2054_v54  ;;  %2213 = vst [vmem:[%s4109_s3 + $0xa0] sm:$0xff] %v2134_v46 }
 0x2d4   : > { %v2434_v22 = vpop.f32.mrf.mxu0  ;;  %v2458_v10 = vpop.f32.mrf.mxu1 }
 0x2d5   : > { %2200 = vst [vmem:[%s4109_s3 + $0x38] sm:$0xff] %v2434_v22  ;;  %2216 = vst [vmem:[%s4109_s3 + $0xb8] sm:$0xff] %v2458_v10 }
 0x2d6   : > { %v2064_v48 = vpop.f32.mrf.mxu0  ;;  %v2144_v26 = vpop.f32.mrf.mxu1 }
 0x2d7   : > { %2199 = vst [vmem:[%s4109_s3 + $0x30] sm:$0xff] %v2064_v48  ;;  %2215 = vst [vmem:[%s4109_s3 + $0xb0] sm:$0xff] %v2144_v26 }
 0x2f7   : > { %v2437_v41 = vpop.f32.mrf.mxu0  ;;  %v2461_v45 = vpop.f32.mrf.mxu1 }
 0x2f8   : > { %2202 = vst [vmem:[%s4109_s3 + $0x48] sm:$0xff] %v2437_v41  ;;  %2218 = vst [vmem:[%s4109_s3 + $0xc8] sm:$0xff] %v2461_v45 }
 0x2f9   : > { %v2074_v59 = vpop.f32.mrf.mxu0  ;;  %v2154_v24 = vpop.f32.mrf.mxu1 }
 0x2fa   : > { %2201 = vst [vmem:[%s4109_s3 + $0x40] sm:$0xff] %v2074_v59  ;;  %2217 = vst [vmem:[%s4109_s3 + $0xc0] sm:$0xff] %v2154_v24 }
 0x31b   : > { %v2440_v21 = vpop.f32.mrf.mxu0  ;;  %v2464_v33 = vpop.f32.mrf.mxu1 }
 0x31c   : > { %2204 = vst [vmem:[%s4109_s3 + $0x58] sm:$0xff] %v2440_v21  ;;  %2220 = vst [vmem:[%s4109_s3 + $0xd8] sm:$0xff] %v2464_v33 }
 0x31d   : > { %v2084_v20 = vpop.f32.mrf.mxu0  ;;  %v2164_v63 = vpop.f32.mrf.mxu1 }
 0x31e   : > { %2203 = vst [vmem:[%s4109_s3 + $0x50] sm:$0xff] %v2084_v20  ;;  %2219 = vst [vmem:[%s4109_s3 + $0xd0] sm:$0xff] %v2164_v63 }
 0x33f   : > { %v2443_v15 = vpop.f32.mrf.mxu0  ;;  %v2467_v13 = vpop.f32.mrf.mxu1 }
 0x340   : > { %2206 = vst [vmem:[%s4109_s3 + $0x68] sm:$0xff] %v2443_v15  ;;  %2222 = vst [vmem:[%s4109_s3 + $0xe8] sm:$0xff] %v2467_v13 }
 0x341   : > { %v2094_v43 = vpop.f32.mrf.mxu0  ;;  %v2174_v5 = vpop.f32.mrf.mxu1 }
 0x342   : > { %2205 = vst [vmem:[%s4109_s3 + $0x60] sm:$0xff] %v2094_v43  ;;  %2221 = vst [vmem:[%s4109_s3 + $0xe0] sm:$0xff] %v2174_v5 }
 0x35b   : > { %v2446_v30 = vpop.f32.mrf.mxu0  ;;  %v2470_v2 = vpop.f32.mrf.mxu1 }
 0x35c   : > { %2208 = vst [vmem:[%s4109_s3 + $0x78] sm:$0xff] %v2446_v30  ;;  %2224 = vst [vmem:[%s4109_s3 + $0xf8] sm:$0xff] %v2470_v2 }
 0x35d   : > { %v2104_v16 = vpop.f32.mrf.mxu0  ;;  %v2184_v37 = vpop.f32.mrf.mxu1 }
 0x35e   : > { %2207 = vst [vmem:[%s4109_s3 + $0x70] sm:$0xff] %v2104_v16  ;;  %2223 = vst [vmem:[%s4109_s3 + $0xf0] sm:$0xff] %v2184_v37 }
 0x35f   : > { %2559 = shalt.err (!%p2556_p5)
}
 0x360   : > { %s2560_s23 = scalar_lea.hbm %s4204_s8, 4096  ;;  %s2564_s26 = scalar_lea.hbm %s4262_s2, 8192 }
 0x361   : > { %p2561_p6 = scmp.ne.s32.totalorder %s4204_s8, %s2560_s23  ;;  %p2565_p10 = scmp.lt.s32.totalorder %s4204_s8, %s4262_s2 }
 0x362   : > { %p2566_p11 = scmp.lt.s32.totalorder %s2564_s26, %s2560_s23 }
 0x363   : > { %p2562_p7 = pnand %p2561_p6, %p2690_p4 }
 0x364   : > { %p2567_p12 = por %p2566_p11, %p2565_p10 }
 0x365   : > { %p2563_p9 = pneg %p2562_p7 }
 0x367   : > { %p2568_p13 = pnand %p2567_p12, %p2563_p9 }
 0x369   : > { %2571 = shalt.err (!%p2568_p13)
}
 0x36a   : > { %s2634_s30 = smov 128  }
 0x36b   : > { %2481 = dma.vmem_to_hbm [thread:$0]  (%p2690_p4), %s4208_s5, 4096, %s4204_s8, %s4214_s12, %s2634_s30, %s2634_s30, %s2626_s29  }
 0x36c PF: > { %p2487_p0 = scmp.ge.s32.totalorder %s2622_s14, 2  ;;  %s2255_s3 = sand.u32 1, %s2602_s9  }
 0x36d   : > { %s2256_s4 = scalar_lea.sflag [#allocation4], %s2255_s3 }
 0x36e   : > { %p2484_p1 = pnand %p2487_p0, %p2697_p8 }
 0x370   : > { %p2485_p2 = pneg %p2484_p1 }
 0x372   : > { %2597 = dma.done.wait (%p2485_p2), %s2256_s4, 4096  }
 0x373   : > { %2599 = vsyncadd (%p2485_p2), %s2256_s4, 4294963200  ;;  %s15_s14 = sadd.s32 1, %s2622_s14   ;;  %s4452_s9 = smov %s2606_s10 }
 0x374   : > { %p12_p3 = scmp.ge.s32.totalorder %s15_s14, 4   ;;  %s4453_s10 = smov %s2610_s11 }
 0x375   : > { %s4454_s11 = smov %s2703_s22  ;;  %s4455_s12 = smov %s2618_s13 }
 0x376   : > { %s4456_s13 = smov %s4458_s17  ;;  %14 = sbr.rel (!%p12_p3) target bundleno = 4 (0x4), region = 69 }
 0x37b   :  { %2261 = vsyncpa [#allocation4], 1 }
 0x37c   :  { %2263 = vsyncpa [#allocation4 + $0x1], 1 }

</bundles_post_ra>
